<compile_context>
chip_gen: v7x
topology: tpu7x:2x2x1
jax: 0.10.0
libtpu: 0.0.40
codegen_flags: <defaults>
</compile_context>

<pallas_src>
import functools
import math

import jax
import jax.numpy as jnp
from jax.experimental import pallas as pl
from jax.experimental.pallas import tpu as pltpu

NUM_HIDDEN = 196
NUM_OUT = 10
NEG_BIG = -1e30   # pad-logit bias: exact under f32 log_softmax


def _log_softmax(x):
    m = jnp.max(x, axis=1, keepdims=True)
    return x - m - jnp.log(jnp.sum(jnp.exp(x - m), axis=1, keepdims=True))


# ----------------------------- Pallas kernels ------------------------------ #
# Forward weight-slab order:  [fcin, fcAB, fcBC, fcCD, fcout]
# Full    weight-slab order:  [fcin, fcAB, fcBA, fcBC, fcCB, fcCD, fcDC, fcout]
# Backward slab order:        [fcBA, fcCB, fcDC]   (torch [out, in] layout)

def _forward_kernel(use_relu,
                    i_ref, w_ref, bias_ref,
                    aN_ref, bN_ref, cN_ref, dN_ref, out_ref, oN_ref):
    act = (lambda x: jnp.maximum(x, 0.0)) if use_relu else (lambda x: x)
    bias = bias_ref[...]                                   # (5, 196)

    def lin(x, k):
        return (jnp.dot(x, w_ref[k], preferred_element_type=jnp.float32)
                + bias[k:k + 1, :])

    aNew = act(lin(i_ref[...], 0))
    bNew = act(lin(aNew, 1))
    cNew = act(lin(bNew, 2))
    dNew = act(lin(cNew, 3))
    oNew = lin(dNew, 4)                                    # lanes >= 10 hold -1e30

    aN_ref[...] = aNew
    bN_ref[...] = bNew
    cN_ref[...] = cNew
    dN_ref[...] = dNew
    out_ref[...] = _log_softmax(oNew)[:, :NUM_OUT]
    oN_ref[...] = oNew[:, :NUM_OUT]


def _full_kernel(gammaFw, betaBw, alphaRec, batch, use_relu,
                 i_ref, a_ref, b_ref, c_ref, d_ref,
                 w_ref, wbw_ref, bias_ref,
                 aN_ref, bN_ref, cN_ref, dN_ref,
                 rA_ref, rB_ref, rC_ref, out_ref, oN_ref):
    act = (lambda x: jnp.maximum(x, 0.0)) if use_relu else (lambda x: x)
    bias = bias_ref[...]                                   # (8, 196)

    def lin(x, k):
        return (jnp.dot(x, w_ref[k], preferred_element_type=jnp.float32)
                + bias[k:k + 1, :])

    def mm(x, k):
        return jnp.dot(x, wbw_ref[k], preferred_element_type=jnp.float32)

    i = i_ref[...]
    a = act(a_ref[...])
    b = act(b_ref[...])
    c = act(c_ref[...])
    d = act(d_ref[...])
    # ('o' is activated in the PyTorch source but never used afterwards.)

    fcBA_b = lin(b, 2)
    fcCB_c = lin(c, 4)
    fcDC_d = lin(d, 6)

    # grad_x mean((x@W^T + b - y)^2) = (2/(batch*196)) * (x@W^T + b - y) @ W
    gA = mm(fcBA_b - a, 0)
    gB = mm(fcCB_c - b, 1)
    gC = mm(fcDC_d - c, 2)

    recon_scale = 2.0 / (batch * NUM_HIDDEN)               # returned grads
    upd_scale = 2.0 * alphaRec / NUM_HIDDEN                # alphaRec*B*recon (B cancels)
    mem = 1.0 - gammaFw - betaBw

    aNew = gammaFw * lin(i, 0) + mem * a + betaBw * fcBA_b
    bNew = gammaFw * lin(aNew, 1) + mem * b + betaBw * fcCB_c - upd_scale * gA
    cNew = gammaFw * lin(bNew, 3) + mem * c + betaBw * fcDC_d - upd_scale * gB
    dNew = gammaFw * lin(cNew, 5) + (1.0 - gammaFw) * d - upd_scale * gC
    oNew = lin(dNew, 7)

    aN_ref[...] = aNew
    bN_ref[...] = bNew
    cN_ref[...] = cNew
    dN_ref[...] = dNew
    rA_ref[...] = recon_scale * gA
    rB_ref[...] = recon_scale * gB
    rC_ref[...] = recon_scale * gC
    out_ref[...] = _log_softmax(oNew)[:, :NUM_OUT]
    oN_ref[...] = oNew[:, :NUM_OUT]


# ----------------------------- wrappers (jitted) ---------------------------- #

def _round_up(n, m):
    return ((n + m - 1) // m) * m


def _batch_tiling(B):
    # >= 2 tiles when batch is big enough (v7x megacore), tile <= 256 rows
    # (matches v6e/v7x MXU, fits v5e's 16 MiB scoped-VMEM default).
    if B <= 16:
        tb = _round_up(B, 8)
    else:
        tb = min(256, _round_up((B + 1) // 2, 8))
    return tb, _round_up(B, tb)


def _pad_batch(x, Bp):
    B = x.shape[0]
    x = x.astype(jnp.float32)
    if Bp == B:
        return x
    return jnp.pad(x, ((0, Bp - B), (0, 0)))


def _act_spec(tb):
    return pl.BlockSpec((tb, NUM_HIDDEN), lambda g: (g, 0))


def _out10_spec(tb):
    return pl.BlockSpec((tb, NUM_OUT), lambda g: (g, 0))


def _resident_spec(shape):
    nd = len(shape)
    return pl.BlockSpec(shape, lambda g, _nd=nd: (0,) * _nd)


def _forward_call(use_relu, params, i):
    B = i.shape[0]
    tb, Bp = _batch_tiling(B)
    i_p = _pad_batch(i, Bp)
    w, bias = params['fwd_w'], params['fwd_b']

    hid = jax.ShapeDtypeStruct((Bp, NUM_HIDDEN), jnp.float32)
    ten = jax.ShapeDtypeStruct((Bp, NUM_OUT), jnp.float32)

    res = pl.pallas_call(
        functools.partial(_forward_kernel, use_relu),
        out_shape=(hid, hid, hid, hid, ten, ten),
        grid=(Bp // tb,),
        in_specs=[_act_spec(tb), _resident_spec(w.shape), _resident_spec(bias.shape)],
        out_specs=(_act_spec(tb), _act_spec(tb), _act_spec(tb), _act_spec(tb),
                   _out10_spec(tb), _out10_spec(tb)),
        compiler_params=pltpu.CompilerParams(dimension_semantics=("parallel",)),
    )(i_p, w, bias)

    aN, bN, cN, dN, out, oN = res
    if Bp != B:
        aN, bN, cN, dN, out, oN = (x[:B] for x in (aN, bN, cN, dN, out, oN))
    return out, aN, bN, cN, dN, oN


def _full_call(use_relu, gammaFw, betaBw, alphaRec, params, i, a, b, c, d):
    B = a.shape[0]
    tb, Bp = _batch_tiling(B)
    acts = [_pad_batch(x, Bp) for x in (i, a, b, c, d)]
    w, wbw, bias = params['full_w'], params['full_wbw'], params['full_b']

    hid = jax.ShapeDtypeStruct((Bp, NUM_HIDDEN), jnp.float32)
    ten = jax.ShapeDtypeStruct((Bp, NUM_OUT), jnp.float32)

    res = pl.pallas_call(
        functools.partial(_full_kernel, gammaFw, betaBw, alphaRec, B, use_relu),
        out_shape=(hid, hid, hid, hid, hid, hid, hid, ten, ten),
        grid=(Bp // tb,),
        in_specs=[_act_spec(tb) for _ in range(5)]
                 + [_resident_spec(w.shape), _resident_spec(wbw.shape),
                    _resident_spec(bias.shape)],
        out_specs=tuple([_act_spec(tb) for _ in range(7)]
                        + [_out10_spec(tb), _out10_spec(tb)]),
        compiler_params=pltpu.CompilerParams(dimension_semantics=("parallel",)),
    )(*acts, w, wbw, bias)

    outs = list(res)
    if Bp != B:
        outs = [x[:B] for x in outs]
    aN, bN, cN, dN, rA, rB, rC, out, oN = outs
    return out, aN, bN, cN, dN, oN, rA, rB, rC


# ------------------------------ model class -------------------------------- #

def _sigmoid(x):
    return 1.0 / (1.0 + math.exp(-x))


class PCMLPPallas:
    def __init__(self, memory, alphaRec, betaFB, gammaFw, linear=False, seed=0):
        self.memory = float(memory)
        self.alphaRec = float(alphaRec)
        self.betaFB = float(betaFB)
        self.gammaFw = float(gammaFw)
        self.use_relu = not linear

        # Deterministic parameter init (nn.Linear-like uniform(-1/sqrt(fan_in), ...)).
        key = jax.random.PRNGKey(seed)
        keys = jax.random.split(key, 8)

        def init_linear(k, fan_in, fan_out):
            kw, kb = jax.random.split(k)
            bound = 1.0 / math.sqrt(fan_in)
            w = jax.random.uniform(kw, (fan_out, fan_in), jnp.float32, -bound, bound)
            bv = jax.random.uniform(kb, (fan_out,), jnp.float32, -bound, bound)
            return w, bv

        names = ['fcin', 'fcAB', 'fcBA', 'fcBC', 'fcCB', 'fcCD', 'fcDC']
        self.params = {}
        for k, name in zip(keys[:7], names):
            self.params[name] = init_linear(k, NUM_HIDDEN, NUM_HIDDEN)
        self.params['fcout'] = init_linear(keys[7], NUM_HIDDEN, NUM_OUT)

        # --- cache kernel-layout parameter slabs once (device arrays) ---
        def wT_pad(w):                       # torch [out, in] -> [196, 196] (out cols padded w/ 0)
            out_dim, in_dim = w.shape
            z = jnp.zeros((NUM_HIDDEN, NUM_HIDDEN), jnp.float32)
            return z.at[:in_dim, :out_dim].set(w.T)

        def bias_pad(bv, fill=0.0):          # [out] -> [196]
            row = jnp.full((NUM_HIDDEN,), fill, jnp.float32)
            return row.at[:bv.shape[0]].set(bv)

        def build_slabs(name_list):
            ws, bs = [], []
            for n in name_list:
                w, bv = self.params[n]
                ws.append(wT_pad(w))
                # Padded logit lanes get bias -1e30 so in-kernel log_softmax over
                # the padded 196 lanes equals log_softmax over the real 10 classes.
                bs.append(bias_pad(bv, fill=(NEG_BIG if n == 'fcout' else 0.0)))
            return jnp.stack(ws), jnp.stack(bs)

        fwd_names = ['fcin', 'fcAB', 'fcBC', 'fcCD', 'fcout']
        full_names = ['fcin', 'fcAB', 'fcBA', 'fcBC', 'fcCB', 'fcCD', 'fcDC', 'fcout']
        fwd_w, fwd_b = build_slabs(fwd_names)
        full_w, full_b = build_slabs(full_names)
        full_wbw = jnp.stack([self.params[n][0] for n in ('fcBA', 'fcCB', 'fcDC')])

        self._padded = jax.device_put({
            'fwd_w': fwd_w, 'fwd_b': fwd_b,
            'full_w': full_w, 'full_b': full_b, 'full_wbw': full_wbw,
        })

        gFw, bBw = self._fb_coeffs()
        self._forward_jit = jax.jit(functools.partial(_forward_call, self.use_relu))
        self._full_jit = jax.jit(functools.partial(
            _full_call, self.use_relu, gFw, bBw, self.alphaRec))

    def _fb_coeffs(self):
        if self.betaFB == 0:
            den = _sigmoid(self.gammaFw) + _sigmoid(self.memory)
            return _sigmoid(self.gammaFw) / den, 0.0
        den = _sigmoid(self.gammaFw) + _sigmoid(self.betaFB) + _sigmoid(self.memory)
        return _sigmoid(self.gammaFw) / den, _sigmoid(self.betaFB) / den

    def __call__(self, i, a, b, c, d, o, networkMode):
        assert networkMode in ('forward', 'full')
        if networkMode == 'forward':
            out, aN, bN, cN, dN, oN = self._forward_jit(self._padded, i)
            return (out, i, aN, bN, cN, dN, oN, [], [], [])
        out, aN, bN, cN, dN, oN, rA, rB, rC = self._full_jit(
            self._padded, i, a, b, c, d)
        return (out, i, aN, bN, cN, dN, oN, rA, rB, rC)


# ------------------------------ pure-JAX ref -------------------------------- #

def _reference(model, i, a, b, c, d, mode):
    act = (lambda x: jnp.maximum(x, 0.0)) if model.use_relu else (lambda x: x)

    def lin(name, x):
        w, bb = model.params[name]
        return jnp.dot(x, w.T, precision='highest') + bb

    if mode == 'forward':
        aN = act(lin('fcin', i)); bN = act(lin('fcAB', aN))
        cN = act(lin('fcBC', bN)); dN = act(lin('fcCD', cN))
        oN = lin('fcout', dN)
        return jax.nn.log_softmax(oN, axis=1), aN, bN, cN, dN, oN, None, None, None

    gammaFw, betaBw = model._fb_coeffs()
    B = a.shape[0]
    a_, b_, c_, d_ = act(a), act(b), act(c), act(d)
    mse = lambda p, y: jnp.mean((p - y) ** 2)
    reconA = jax.grad(lambda x: mse(lin('fcBA', x), a_))(b_)
    reconB = jax.grad(lambda x: mse(lin('fcCB', x), b_))(c_)
    reconC = jax.grad(lambda x: mse(lin('fcDC', x), c_))(d_)
    mem = 1.0 - gammaFw - betaBw
    aN = gammaFw * lin('fcin', i) + mem * a_ + betaBw * lin('fcBA', b_)
    bN = gammaFw * lin('fcAB', aN) + mem * b_ + betaBw * lin('fcCB', c_) - model.alphaRec * B * reconA
    cN = gammaFw * lin('fcBC', bN) + mem * c_ + betaBw * lin('fcDC', d_) - model.alphaRec * B * reconB
    dN = gammaFw * lin('fcCD', cN) + (1.0 - gammaFw) * d_ - model.alphaRec * B * reconC
    oN = lin('fcout', dN)
    return jax.nn.log_softmax(oN, axis=1), aN, bN, cN, dN, oN, reconA, reconB, reconC


# ---------------------------------- main ------------------------------------ #

if __name__ == "__main__":
    B = 8
    model = PCMLPPallas(memory=1.0, alphaRec=0.01, betaFB=0.33, gammaFw=0.33)

    key = jax.random.PRNGKey(0)
    ki, ka, kb, kc, kd, ko = jax.random.split(key, 6)
    i = jax.random.normal(ki, (B, NUM_HIDDEN), jnp.float32)
    a = jax.random.normal(ka, (B, NUM_HIDDEN), jnp.float32)
    b = jax.random.normal(kb, (B, NUM_HIDDEN), jnp.float32)
    c = jax.random.normal(kc, (B, NUM_HIDDEN), jnp.float32)
    d = jax.random.normal(kd, (B, NUM_HIDDEN), jnp.float32)
    o = jax.random.normal(ko, (B, NUM_OUT), jnp.float32)

    # forward mode
    res_f = model(i, a, b, c, d, o, 'forward')
    jax.block_until_ready(res_f[0])
    ref_f = _reference(model, i, a, b, c, d, 'forward')
    for got, want in zip([res_f[0], res_f[2], res_f[3], res_f[4], res_f[5], res_f[6]],
                         [ref_f[0], ref_f[1], ref_f[2], ref_f[3], ref_f[4], ref_f[5]]):
        assert got.shape == want.shape, "forward-mode shape mismatch"
        assert jnp.allclose(got, want, atol=2e-3, rtol=2e-3), "forward-mode mismatch"

    # full mode
    res = model(i, a, b, c, d, o, 'full')
    jax.block_until_ready(res[0])
    ref = _reference(model, i, a, b, c, d, 'full')
    for got, want in zip([res[0], res[2], res[3], res[4], res[5], res[6], res[7], res[8], res[9]],
                         list(ref)):
        assert got.shape == want.shape, "full-mode shape mismatch"
        assert jnp.allclose(got, want, atol=2e-3, rtol=2e-3), "full-mode mismatch"

    print("KERNEL_OK")
</pallas_src>

<mosaic_0001>
module attributes {stable_mosaic.version = 11 : i64} {
  func.func @_forward_kernel(%arg0: i32, %arg1: memref<8x196xf32, #tpu.memory_space<vmem>>, %arg2: memref<5x196x196xf32, #tpu.memory_space<vmem>>, %arg3: memref<5x196xf32, #tpu.memory_space<vmem>>, %arg4: memref<8x196xf32, #tpu.memory_space<vmem>>, %arg5: memref<8x196xf32, #tpu.memory_space<vmem>>, %arg6: memref<8x196xf32, #tpu.memory_space<vmem>>, %arg7: memref<8x196xf32, #tpu.memory_space<vmem>>, %arg8: memref<8x10xf32, #tpu.memory_space<vmem>>, %arg9: memref<8x10xf32, #tpu.memory_space<vmem>>) attributes {dimension_semantics = [#tpu.dimension_semantics<parallel>], iteration_bounds = array<i64: 1>, scalar_prefetch = 0 : i64, scratch_operands = 0 : i64, tpu.core_type = #tpu.core_type<tc>, window_params = [{transform_indices = @transform_0, window_bounds = array<i64: 8, 196>}, {pipeline_mode = #tpu.pipeline_mode<synchronous>, transform_indices = @transform_1, window_bounds = array<i64: 5, 196, 196>}, {pipeline_mode = #tpu.pipeline_mode<synchronous>, transform_indices = @transform_2, window_bounds = array<i64: 5, 196>}, {transform_indices = @transform_3, window_bounds = array<i64: 8, 196>}, {transform_indices = @transform_4, window_bounds = array<i64: 8, 196>}, {transform_indices = @transform_5, window_bounds = array<i64: 8, 196>}, {transform_indices = @transform_6, window_bounds = array<i64: 8, 196>}, {transform_indices = @transform_7, window_bounds = array<i64: 8, 10>}, {transform_indices = @transform_8, window_bounds = array<i64: 8, 10>}]} {
    %c0 = arith.constant 0 : index
    %c0_0 = arith.constant 0 : index
    %0 = vector.load %arg3[%c0, %c0_0] : memref<5x196xf32, #tpu.memory_space<vmem>>, vector<5x196xf32>
    %c0_1 = arith.constant 0 : index
    %c0_2 = arith.constant 0 : index
    %1 = vector.load %arg1[%c0_1, %c0_2] : memref<8x196xf32, #tpu.memory_space<vmem>>, vector<8x196xf32>
    %c0_3 = arith.constant 0 : index
    %c0_4 = arith.constant 0 : index
    %c0_5 = arith.constant 0 : index
    %2 = vector.load %arg2[%c0_3, %c0_4, %c0_5] : memref<5x196x196xf32, #tpu.memory_space<vmem>>, vector<1x196x196xf32>
    %3 = vector.shape_cast %2 : vector<1x196x196xf32> to vector<196x196xf32>
    %cst = arith.constant dense<0.000000e+00> : vector<8x196xf32>
    %4 = tpu.matmul %1, %3, %cst {dimension_numbers = #tpu.dot_dimension_numbers<[1], [0], [0], [1], [0, 0, 1, 1], [], []>} : vector<8x196xf32>, vector<196x196xf32>, vector<8x196xf32> -> vector<8x196xf32>
    %5 = vector.extract_strided_slice %0 {offsets = [0, 0], sizes = [1, 196], strides = [1, 1]} : vector<5x196xf32> to vector<1x196xf32>
    %6 = vector.broadcast %5 : vector<1x196xf32> to vector<8x196xf32>
    %7 = arith.addf %4, %6 : vector<8x196xf32>
    %cst_6 = arith.constant 0.000000e+00 : f32
    %8 = vector.broadcast %cst_6 : f32 to vector<8x196xf32>
    %9 = arith.maximumf %7, %8 : vector<8x196xf32>
    %c1 = arith.constant 1 : index
    %c0_7 = arith.constant 0 : index
    %c0_8 = arith.constant 0 : index
    %10 = vector.load %arg2[%c1, %c0_7, %c0_8] : memref<5x196x196xf32, #tpu.memory_space<vmem>>, vector<1x196x196xf32>
    %11 = vector.shape_cast %10 : vector<1x196x196xf32> to vector<196x196xf32>
    %cst_9 = arith.constant dense<0.000000e+00> : vector<8x196xf32>
    %12 = tpu.matmul %9, %11, %cst_9 {dimension_numbers = #tpu.dot_dimension_numbers<[1], [0], [0], [1], [0, 0, 1, 1], [], []>} : vector<8x196xf32>, vector<196x196xf32>, vector<8x196xf32> -> vector<8x196xf32>
    %13 = vector.extract_strided_slice %0 {offsets = [1, 0], sizes = [1, 196], strides = [1, 1]} : vector<5x196xf32> to vector<1x196xf32>
    %14 = vector.broadcast %13 : vector<1x196xf32> to vector<8x196xf32>
    %15 = arith.addf %12, %14 : vector<8x196xf32>
    %cst_10 = arith.constant 0.000000e+00 : f32
    %16 = vector.broadcast %cst_10 : f32 to vector<8x196xf32>
    %17 = arith.maximumf %15, %16 : vector<8x196xf32>
    %c2 = arith.constant 2 : index
    %c0_11 = arith.constant 0 : index
    %c0_12 = arith.constant 0 : index
    %18 = vector.load %arg2[%c2, %c0_11, %c0_12] : memref<5x196x196xf32, #tpu.memory_space<vmem>>, vector<1x196x196xf32>
    %19 = vector.shape_cast %18 : vector<1x196x196xf32> to vector<196x196xf32>
    %cst_13 = arith.constant dense<0.000000e+00> : vector<8x196xf32>
    %20 = tpu.matmul %17, %19, %cst_13 {dimension_numbers = #tpu.dot_dimension_numbers<[1], [0], [0], [1], [0, 0, 1, 1], [], []>} : vector<8x196xf32>, vector<196x196xf32>, vector<8x196xf32> -> vector<8x196xf32>
    %21 = vector.extract_strided_slice %0 {offsets = [2, 0], sizes = [1, 196], strides = [1, 1]} : vector<5x196xf32> to vector<1x196xf32>
    %22 = vector.broadcast %21 : vector<1x196xf32> to vector<8x196xf32>
    %23 = arith.addf %20, %22 : vector<8x196xf32>
    %cst_14 = arith.constant 0.000000e+00 : f32
    %24 = vector.broadcast %cst_14 : f32 to vector<8x196xf32>
    %25 = arith.maximumf %23, %24 : vector<8x196xf32>
    %c3 = arith.constant 3 : index
    %c0_15 = arith.constant 0 : index
    %c0_16 = arith.constant 0 : index
    %26 = vector.load %arg2[%c3, %c0_15, %c0_16] : memref<5x196x196xf32, #tpu.memory_space<vmem>>, vector<1x196x196xf32>
    %27 = vector.shape_cast %26 : vector<1x196x196xf32> to vector<196x196xf32>
    %cst_17 = arith.constant dense<0.000000e+00> : vector<8x196xf32>
    %28 = tpu.matmul %25, %27, %cst_17 {dimension_numbers = #tpu.dot_dimension_numbers<[1], [0], [0], [1], [0, 0, 1, 1], [], []>} : vector<8x196xf32>, vector<196x196xf32>, vector<8x196xf32> -> vector<8x196xf32>
    %29 = vector.extract_strided_slice %0 {offsets = [3, 0], sizes = [1, 196], strides = [1, 1]} : vector<5x196xf32> to vector<1x196xf32>
    %30 = vector.broadcast %29 : vector<1x196xf32> to vector<8x196xf32>
    %31 = arith.addf %28, %30 : vector<8x196xf32>
    %cst_18 = arith.constant 0.000000e+00 : f32
    %32 = vector.broadcast %cst_18 : f32 to vector<8x196xf32>
    %33 = arith.maximumf %31, %32 : vector<8x196xf32>
    %c4 = arith.constant 4 : index
    %c0_19 = arith.constant 0 : index
    %c0_20 = arith.constant 0 : index
    %34 = vector.load %arg2[%c4, %c0_19, %c0_20] : memref<5x196x196xf32, #tpu.memory_space<vmem>>, vector<1x196x196xf32>
    %35 = vector.shape_cast %34 : vector<1x196x196xf32> to vector<196x196xf32>
    %cst_21 = arith.constant dense<0.000000e+00> : vector<8x196xf32>
    %36 = tpu.matmul %33, %35, %cst_21 {dimension_numbers = #tpu.dot_dimension_numbers<[1], [0], [0], [1], [0, 0, 1, 1], [], []>} : vector<8x196xf32>, vector<196x196xf32>, vector<8x196xf32> -> vector<8x196xf32>
    %37 = vector.extract_strided_slice %0 {offsets = [4, 0], sizes = [1, 196], strides = [1, 1]} : vector<5x196xf32> to vector<1x196xf32>
    %38 = vector.broadcast %37 : vector<1x196xf32> to vector<8x196xf32>
    %39 = arith.addf %36, %38 : vector<8x196xf32>
    %c0_22 = arith.constant 0 : index
    %c0_23 = arith.constant 0 : index
    %40 = vector.load %arg4[%c0_22, %c0_23] : memref<8x196xf32, #tpu.memory_space<vmem>>, vector<8x196xf32>
    tpu.vector_store %arg4[%c0_22, %c0_23], %9 {strides = array<i32>} : memref<8x196xf32, #tpu.memory_space<vmem>>, vector<8x196xf32>,
    %c0_24 = arith.constant 0 : index
    %c0_25 = arith.constant 0 : index
    %41 = vector.load %arg5[%c0_24, %c0_25] : memref<8x196xf32, #tpu.memory_space<vmem>>, vector<8x196xf32>
    tpu.vector_store %arg5[%c0_24, %c0_25], %17 {strides = array<i32>} : memref<8x196xf32, #tpu.memory_space<vmem>>, vector<8x196xf32>,
    %c0_26 = arith.constant 0 : index
    %c0_27 = arith.constant 0 : index
    %42 = vector.load %arg6[%c0_26, %c0_27] : memref<8x196xf32, #tpu.memory_space<vmem>>, vector<8x196xf32>
    tpu.vector_store %arg6[%c0_26, %c0_27], %25 {strides = array<i32>} : memref<8x196xf32, #tpu.memory_space<vmem>>, vector<8x196xf32>,
    %c0_28 = arith.constant 0 : index
    %c0_29 = arith.constant 0 : index
    %43 = vector.load %arg7[%c0_28, %c0_29] : memref<8x196xf32, #tpu.memory_space<vmem>>, vector<8x196xf32>
    tpu.vector_store %arg7[%c0_28, %c0_29], %33 {strides = array<i32>} : memref<8x196xf32, #tpu.memory_space<vmem>>, vector<8x196xf32>,
    %cst_30 = arith.constant dense<0xFF800000> : vector<8xf32>
    %44 = vector.multi_reduction <maximumf>, %39, %cst_30 [1] : vector<8x196xf32> to vector<8xf32>
    %45 = vector.shape_cast %44 : vector<8xf32> to vector<8x1xf32>
    %46 = vector.broadcast %45 : vector<8x1xf32> to vector<8x196xf32>
    %47 = arith.subf %39, %46 : vector<8x196xf32>
    %48 = vector.broadcast %45 : vector<8x1xf32> to vector<8x196xf32>
    %49 = arith.subf %39, %48 : vector<8x196xf32>
    %50 = math.exp %49 : vector<8x196xf32>
    %cst_31 = arith.constant dense<0.000000e+00> : vector<8xf32>
    %51 = vector.multi_reduction <add>, %50, %cst_31 [1] : vector<8x196xf32> to vector<8xf32>
    %52 = vector.shape_cast %51 : vector<8xf32> to vector<8x1xf32>
    %53 = math.log %52 : vector<8x1xf32>
    %54 = vector.broadcast %53 : vector<8x1xf32> to vector<8x196xf32>
    %55 = arith.subf %47, %54 : vector<8x196xf32>
    %56 = vector.extract_strided_slice %55 {offsets = [0, 0], sizes = [8, 10], strides = [1, 1]} : vector<8x196xf32> to vector<8x10xf32>
    %c0_32 = arith.constant 0 : index
    %c0_33 = arith.constant 0 : index
    %57 = vector.load %arg8[%c0_32, %c0_33] : memref<8x10xf32, #tpu.memory_space<vmem>>, vector<8x10xf32>
    tpu.vector_store %arg8[%c0_32, %c0_33], %56 {strides = array<i32>} : memref<8x10xf32, #tpu.memory_space<vmem>>, vector<8x10xf32>,
    %58 = vector.extract_strided_slice %39 {offsets = [0, 0], sizes = [8, 10], strides = [1, 1]} : vector<8x196xf32> to vector<8x10xf32>
    %c0_34 = arith.constant 0 : index
    %c0_35 = arith.constant 0 : index
    %59 = vector.load %arg9[%c0_34, %c0_35] : memref<8x10xf32, #tpu.memory_space<vmem>>, vector<8x10xf32>
    tpu.vector_store %arg9[%c0_34, %c0_35], %58 {strides = array<i32>} : memref<8x10xf32, #tpu.memory_space<vmem>>, vector<8x10xf32>,
    return
  }
  func.func @transform_0(%arg0: i32) -> (i32, i32) {
    %c0_i32 = arith.constant 0 : i32
    %c0_i32_0 = arith.constant 0 : i32
    return %arg0, %c0_i32 : i32, i32
  }
  func.func @transform_1(%arg0: i32) -> (i32, i32, i32) {
    %c0_i32 = arith.constant 0 : i32
    %c0_i32_0 = arith.constant 0 : i32
    %c0_i32_1 = arith.constant 0 : i32
    %c0_i32_2 = arith.constant 0 : i32
    return %c0_i32, %c0_i32_0, %c0_i32_1 : i32, i32, i32
  }
  func.func @transform_2(%arg0: i32) -> (i32, i32) {
    %c0_i32 = arith.constant 0 : i32
    %c0_i32_0 = arith.constant 0 : i32
    %c0_i32_1 = arith.constant 0 : i32
    return %c0_i32, %c0_i32_0 : i32, i32
  }
  func.func @transform_3(%arg0: i32) -> (i32, i32) {
    %c0_i32 = arith.constant 0 : i32
    %c0_i32_0 = arith.constant 0 : i32
    return %arg0, %c0_i32 : i32, i32
  }
  func.func @transform_4(%arg0: i32) -> (i32, i32) {
    %c0_i32 = arith.constant 0 : i32
    %c0_i32_0 = arith.constant 0 : i32
    return %arg0, %c0_i32 : i32, i32
  }
  func.func @transform_5(%arg0: i32) -> (i32, i32) {
    %c0_i32 = arith.constant 0 : i32
    %c0_i32_0 = arith.constant 0 : i32
    return %arg0, %c0_i32 : i32, i32
  }
  func.func @transform_6(%arg0: i32) -> (i32, i32) {
    %c0_i32 = arith.constant 0 : i32
    %c0_i32_0 = arith.constant 0 : i32
    return %arg0, %c0_i32 : i32, i32
  }
  func.func @transform_7(%arg0: i32) -> (i32, i32) {
    %c0_i32 = arith.constant 0 : i32
    %c0_i32_0 = arith.constant 0 : i32
    return %arg0, %c0_i32 : i32, i32
  }
  func.func @transform_8(%arg0: i32) -> (i32, i32) {
    %c0_i32 = arith.constant 0 : i32
    %c0_i32_0 = arith.constant 0 : i32
    return %arg0, %c0_i32 : i32, i32
  }
}

</mosaic_0001>

<bundles_post_ra>
// kernel: _forward_call.1
= control target key start
LH: loop header
LB: loop body
LE: loop exit
PB: predicated region body
PF: predicated region fallthrough
CT: control target
= control target key end

     0   :  { %14 = vsyncpa [#allocation3], 0  ;;  %s1575_s0 = inlined_call_operand.hbm [shape: f32[8,196], index: 0, kind: input, shape index: {}]   ;;  %s1576_s1 = inlined_call_operand.hbm [shape: f32[5,196,196], index: 1, kind: input, shape index: {}]   ;;  %s1577_s2 = inlined_call_operand.hbm [shape: f32[5,196], index: 2, kind: input, shape index: {}]   ;;  %s1578_s3 = inlined_call_operand.hbm [shape: f32[8,196], index: 3, kind: output, shape index: {0}]   ;;  %s1579_s4 = inlined_call_operand.hbm [shape: f32[8,196], index: 4, kind: output, shape index: {1}]   ;;  %s1580_s5 = inlined_call_operand.hbm [shape: f32[8,196], index: 5, kind: output, shape index: {2}]   ;;  %s1581_s6 = inlined_call_operand.hbm [shape: f32[8,196], index: 6, kind: output, shape index: {3}]   ;;  %s1582_s7 = inlined_call_operand.hbm [shape: f32[8,10], index: 7, kind: output, shape index: {4}]   ;;  %s1583_s8 = inlined_call_operand.hbm [shape: f32[8,10], index: 8, kind: output, shape index: {5}]  }
   0x1   :  { %15 = vsyncpa [#allocation6], 0 }
   0x2   :  { %16 = vsyncpa [#allocation4], 0 }
   0x3   :  { %17 = vsyncpa [#allocation10], 0 }
   0x4   :  { %18 = vsyncpa [#allocation13], 0 }
   0x5   :  { %19 = vsyncpa [#allocation16], 0  ;;  %s1363_s27 = smov [#allocation5]   ;;  %s1153_s9 = scalar_lea.hbm %s1576_s1, 32000 }
   0x6   :  { %s35_s28 = sshll.u32 %s1363_s27, 4  ;;  %p1154_p0 = scmp.ne.s32.totalorder %s1576_s1, %s1153_s9  ;;  %s36_s28 = int_to_ptr.vmem [resolvable:$true] %s35_s28 }
   0x7   :  { %p1157_p1 = scmp.lt.u32.totalorder %s1153_s9, %s1576_s1 }
   0x9   :  { %p1159_p2 = pnand %p1157_p1, %p1154_p0 }
   0xb   :  { %1162 = shalt.err (!%p1159_p2)
}
   0xc   :  { %s1163_s14 = scalar_lea.vmem %s36_s28, 32000  ;;  %p1168_p4 = scmp.lt.s32.totalorder %s36_s28, %s36_s28 }
   0xd   :  { %p1164_p3 = scmp.ne.s32.totalorder %s36_s28, %s1163_s14  ;;  %p1169_p5 = scmp.lt.s32.totalorder %s1163_s14, %s1163_s14 }
   0xf   :  { %p1170_p6 = por %p1169_p5, %p1168_p4 }
  0x11   :  { %p1171_p7 = pnand %p1170_p6, %p1164_p3 }
  0x13   :  { %1174 = shalt.err (!%p1171_p7)
}
  0x14   :  { %s1364_s15 = smov 256   ;;  %s1365_s16 = smov 16  }
  0x15   :  { %41 = dma.hbm_to_vmem [thread:$0]  %s1576_s1, 32000, %s36_s28, [#allocation6], %s1364_s15, %s1364_s15, %s1365_s16  }
  0x16   :  { %s1366_s19 = smov [#allocation2]   ;;  %s1367_s21 = smov [#allocation7]  }
  0x17   :  { %s26_s20 = sshll.u32 %s1366_s19, 4  ;;  %s48_s22 = sshll.u32 %s1367_s21, 4  ;;  %s27_s20 = int_to_ptr.vmem [resolvable:$true] %s26_s20  ;;  %s49_s22 = int_to_ptr.vmem [resolvable:$true] %s48_s22 }
  0x18   :  { %s1175_s25 = scalar_lea.hbm %s1575_s0, 256 }
  0x19   :  { %p1176_p8 = scmp.ne.s32.totalorder %s1575_s0, %s1175_s25  ;;  %p1179_p9 = scmp.lt.u32.totalorder %s1175_s25, %s1575_s0 }
  0x1b   :  { %p1181_p10 = pnand %p1179_p9, %p1176_p8 }
  0x1d   :  { %1184 = shalt.err (!%p1181_p10)
}
  0x1e   :  { %s1185_s1 = scalar_lea.vmem %s27_s20, 256  ;;  %p1190_p12 = scmp.lt.s32.totalorder %s27_s20, %s27_s20 }
  0x1f   :  { %p1186_p11 = scmp.ne.s32.totalorder %s27_s20, %s1185_s1  ;;  %p1191_p13 = scmp.lt.s32.totalorder %s1185_s1, %s1185_s1 }
  0x21   :  { %p1192_p0 = por %p1191_p13, %p1190_p12 }
  0x23   :  { %p1193_p1 = pnand %p1192_p0, %p1186_p11 }
  0x25   :  { %1196 = shalt.err (!%p1193_p1)
}
  0x26   :  { %29 = dma.hbm_to_vmem [thread:$0]  %s1575_s0, 256, %s27_s20, [#allocation3]  }
  0x27   :  { %s1197_s12 = scalar_lea.hbm %s1577_s2, 256 }
  0x28   :  { %p1198_p2 = scmp.ne.s32.totalorder %s1577_s2, %s1197_s12  ;;  %p1201_p3 = scmp.lt.u32.totalorder %s1197_s12, %s1577_s2 }
  0x2a   :  { %p1203_p4 = pnand %p1201_p3, %p1198_p2 }
  0x2c   :  { %1206 = shalt.err (!%p1203_p4)
}
  0x2d   :  { %s1207_s17 = scalar_lea.vmem %s49_s22, 256  ;;  %p1212_p6 = scmp.lt.s32.totalorder %s49_s22, %s49_s22 }
  0x2e   :  { %p1208_p5 = scmp.ne.s32.totalorder %s49_s22, %s1207_s17  ;;  %p1213_p7 = scmp.lt.s32.totalorder %s1207_s17, %s1207_s17 }
  0x30   :  { %p1214_p8 = por %p1213_p7, %p1212_p6 }
  0x32   :  { %p1215_p9 = pnand %p1214_p8, %p1208_p5 }
  0x34   :  { %1218 = shalt.err (!%p1215_p9)
}
  0x35   :  { %51 = dma.hbm_to_vmem [thread:$0]  %s1577_s2, 256, %s49_s22, [#allocation6]  }
  0x36   :  { %1351 = dma.done.wait [#allocation3], 256  }
  0x37   :  { %1352 = vsyncadd [#allocation3], 4294967040 }
  0x38   :  { %1353 = dma.done.wait [#allocation6], 32256  }
  0x39   :  { %1354 = vsyncadd [#allocation6], 4294935040  ;;  %v66_v0 = vld [vmem:[#allocation5 + $0x8] sm:$0xff]  ;;  %v68_v1 = vld [vmem:[#allocation5 + $0x18] sm:$0xff]  ;;  %vm123_vm0 = vcmask 556032   ;;  %vm127_vm1 = vcmask 1043456  }
  0x3a   :  { %v65_v2 = vld [vmem:[#allocation5] sm:$0xff]  ;;  %v896_v3 = vpack.c.bf16 %v68_v1, %v66_v0  ;;  %v67_v4 = vld [vmem:[#allocation5 + $0x10] sm:$0xff]  ;;  %v70_v5 = vld [vmem:[#allocation5 + $0x28] sm:$0xff]  ;;  %vm794_vm2 = vcmask 80896   ;;  %s1368_s2 = smov [#allocation9]   ;;  %s1369_s20 = smov [#allocation12]  }
  0x3b   :  { %v72_v6 = vld [vmem:[#allocation5 + $0x38] sm:$0xff]  ;;  %v898_v7 = vpack.c.bf16 %v67_v4, %v65_v2  ;;  %v69_v9 = vld [vmem:[#allocation5 + $0x20] sm:$0xff]  ;;  %v71_v10 = vld [vmem:[#allocation5 + $0x30] sm:$0xff]  ;;  %s813_s19 = sshll.u32 %s1368_s2, 4  ;;  %s833_s21 = sshll.u32 %s1369_s20, 4  ;;  %s814_s19 = int_to_ptr.vmem [resolvable:$true] %s813_s19  ;;  %s834_s21 = int_to_ptr.vmem [resolvable:$true] %s833_s21 }
  0x3c   :  { %v900_v8 = vpack.c.bf16 %v72_v6, %v70_v5  ;;  %v74_v11 = vld [vmem:[#allocation5 + $0x48] sm:$0xff]  ;;  %897 = vmatprep.subr.bf16.mxu0 %v896_v3  ;;  %v76_v12 = vld [vmem:[#allocation5 + $0x58] sm:$0xff]  ;;  %v902_v13 = vpack.c.bf16 %v71_v10, %v69_v9  ;;  %v73_v15 = vld [vmem:[#allocation5 + $0x40] sm:$0xff]  ;;  %s1219_s22 = scalar_lea.vmem %s814_s19, 256  ;;  %p1224_p11 = scmp.lt.s32.totalorder %s814_s19, %s814_s19 }
  0x3d   :  { %899 = vmatpush1.bf16.msra.mxu0 %v898_v7  ;;  %v904_v14 = vpack.c.bf16 %v76_v12, %v74_v11  ;;  %v75_v16 = vld [vmem:[#allocation5 + $0x50] sm:$0xff]  ;;  %v78_v17 = vld [vmem:[#allocation5 + $0x68] sm:$0xff]  ;;  %v80_v18 = vld [vmem:[#allocation5 + $0x78] sm:$0xff]  ;;  %p1220_p10 = scmp.ne.s32.totalorder %s814_s19, %s1219_s22  ;;  %p1225_p12 = scmp.lt.s32.totalorder %s1219_s22, %s1219_s22 }
  0x3e   :  { %901 = vmatprep.subr.bf16.mxu0 %v900_v8  ;;  %v906_v19 = vpack.c.bf16 %v75_v16, %v73_v15  ;;  %v908_v20 = vpack.c.bf16 %v80_v18, %v78_v17  ;;  %v77_v21 = vld [vmem:[#allocation5 + $0x60] sm:$0xff]  ;;  %v79_v22 = vld [vmem:[#allocation5 + $0x70] sm:$0xff]  ;;  %v82_v23 = vld [vmem:[#allocation5 + $0x88] sm:$0xff] }
  0x3f   :  { %v84_v24 = vld [vmem:[#allocation5 + $0x98] sm:$0xff]  ;;  %v910_v25 = vpack.c.bf16 %v79_v22, %v77_v21  ;;  %v81_v27 = vld [vmem:[#allocation5 + $0x80] sm:$0xff]  ;;  %v83_v28 = vld [vmem:[#allocation5 + $0x90] sm:$0xff]  ;;  %p1226_p13 = por %p1225_p12, %p1224_p11 }
  0x40   :  { %v912_v26 = vpack.c.bf16 %v84_v24, %v82_v23  ;;  %v86_v29 = vld [vmem:[#allocation5 + $0xa8] sm:$0xff]  ;;  %v88_v30 = vld [vmem:[#allocation5 + $0xb8] sm:$0xff]  ;;  %v85_v31 = vld [vmem:[#allocation5 + $0xa0] sm:$0xff]  ;;  %v914_v32 = vpack.c.bf16 %v83_v28, %v81_v27 }
  0x41   :  { %903 = vmatpush1.bf16.msra.mxu0 %v902_v13  ;;  %v87_v33 = vld [vmem:[#allocation5 + $0xb0] sm:$0xff]  ;;  %v90_v34 = vld [vmem:[#allocation5 + $0xc8] sm:$0xff]  ;;  %v64_v35 = vld [vmem:[#allocation2 + $0x8] sm:$0xff]  ;;  %v916_v36 = vpack.c.bf16 %v88_v30, %v86_v29  ;;  %p1227_p0 = pnand %p1226_p13, %p1220_p10 }
  0x42   :  { %905 = vmatprep.subr.bf16.mxu0 %v904_v14  ;;  %v92_v37 = vld [vmem:[#allocation5 + $0xd8] sm:$0xff]  ;;  %883 = vmatprep.mubr.msk.f32.mxu0 %vm123_vm0, %v64_v35  ;;  %v211_v39 = vld [vmem:[#allocation5 + $0x1a8] sm:$0xff]  ;;  %v208_v41 = vld [vmem:[#allocation5 + $0x190] sm:$0xff]  ;;  %v918_v48 = vpack.c.bf16 %v87_v33, %v85_v31 }
  0x43   :  { %v209_v38 = vld [vmem:[#allocation5 + $0x198] sm:$0xff]  ;;  %v210_v42 = vld [vmem:[#allocation5 + $0x1a0] sm:$0xff]  ;;  %v215_v45 = vld [vmem:[#allocation5 + $0x1c8] sm:$0xff]  ;;  %v920_v52 = vpack.c.bf16 %v92_v37, %v90_v34 }
  0x44   :  { %v944_v40 = vpack.c.bf16 %v211_v39, %v209_v38  ;;  %v213_v43 = vld [vmem:[#allocation5 + $0x1b8] sm:$0xff]  ;;  %v946_v44 = vpack.c.bf16 %v210_v42, %v208_v41  ;;  %v212_v46 = vld [vmem:[#allocation5 + $0x1b0] sm:$0xff]  ;;  %v214_v47 = vld [vmem:[#allocation5 + $0x1c0] sm:$0xff] }
  0x45   :  { %907 = vmatpush1.bf16.msra.mxu0 %v906_v19  ;;  %v948_v49 = vpack.c.bf16 %v215_v45, %v213_v43  ;;  %v217_v50 = vld [vmem:[#allocation5 + $0x1d8] sm:$0xff]  ;;  %v219_v51 = vld [vmem:[#allocation5 + $0x1e8] sm:$0xff]  ;;  %v89_v53 = vld [vmem:[#allocation5 + $0xc0] sm:$0xff]  ;;  %v950_v56 = vpack.c.bf16 %v214_v47, %v212_v46 }
  0x46   :  { %909 = vmatprep.subr.bf16.mxu0 %v908_v20  ;;  %945 = vmatprep.subr.bf16.mxu1 %v944_v40  ;;  %v91_v54 = vld [vmem:[#allocation5 + $0xd0] sm:$0xff]  ;;  %v94_v55 = vld [vmem:[#allocation5 + $0xe8] sm:$0xff]  ;;  %v96_v57 = vld [vmem:[#allocation5 + $0xf8] sm:$0xff]  ;;  %v952_v58 = vpack.c.bf16 %v219_v51, %v217_v50 }
  0x47   :  { %947 = vmatpush1.bf16.msra.mxu1 %v946_v44  ;;  %v216_v59 = vld [vmem:[#allocation5 + $0x1d0] sm:$0xff]  ;;  %v218_v60 = vld [vmem:[#allocation5 + $0x1e0] sm:$0xff]  ;;  %v221_v61 = vld [vmem:[#allocation5 + $0x1f8] sm:$0xff]  ;;  %v922_v63 = vpack.c.bf16 %v91_v54, %v89_v53  ;;  %v924_v0 = vpack.c.bf16 %v96_v57, %v94_v55 }
  0x48   :  { %949 = vmatprep.subr.bf16.mxu1 %v948_v49  ;;  %v223_v62 = vld [vmem:[#allocation5 + $0x208] sm:$0xff]  ;;  %v93_v1 = vld [vmem:[#allocation5 + $0xe0] sm:$0xff]  ;;  %v95_v2 = vld [vmem:[#allocation5 + $0xf0] sm:$0xff]  ;;  %v954_v4 = vpack.c.bf16 %v218_v60, %v216_v59 }
  0x49   :  { %911 = vmatpush1.bf16.msra.mxu0 %v910_v25  ;;  %v98_v3 = vld [vmem:[#allocation5 + $0x108] sm:$0xff]  ;;  %v100_v5 = vld [vmem:[#allocation5 + $0x118] sm:$0xff]  ;;  %v956_v6 = vpack.c.bf16 %v223_v62, %v221_v61  ;;  %v220_v7 = vld [vmem:[#allocation5 + $0x1f0] sm:$0xff]  ;;  %v926_v11 = vpack.c.bf16 %v95_v2, %v93_v1 }
  0x4a   :  { %913 = vmatprep.subr.bf16.mxu0 %v912_v26  ;;  %v222_v8 = vld [vmem:[#allocation5 + $0x200] sm:$0xff]  ;;  %v225_v9 = vld [vmem:[#allocation5 + $0x218] sm:$0xff]  ;;  %v227_v10 = vld [vmem:[#allocation5 + $0x228] sm:$0xff]  ;;  %v928_v12 = vpack.c.bf16 %v100_v5, %v98_v3 }
  0x4b   :  { %951 = vmatpush1.bf16.msra.mxu1 %v950_v56  ;;  %v97_v13 = vld [vmem:[#allocation5 + $0x100] sm:$0xff]  ;;  %v99_v14 = vld [vmem:[#allocation5 + $0x110] sm:$0xff]  ;;  %v102_v15 = vld [vmem:[#allocation5 + $0x128] sm:$0xff]  ;;  %v958_v16 = vpack.c.bf16 %v222_v8, %v220_v7  ;;  %v960_v18 = vpack.c.bf16 %v227_v10, %v225_v9 }
  0x4c   :  { %953 = vmatprep.subr.bf16.mxu1 %v952_v58  ;;  %v104_v17 = vld [vmem:[#allocation5 + $0x138] sm:$0xff]  ;;  %v224_v19 = vld [vmem:[#allocation5 + $0x210] sm:$0xff]  ;;  %v226_v20 = vld [vmem:[#allocation5 + $0x220] sm:$0xff]  ;;  %v930_v23 = vpack.c.bf16 %v99_v14, %v97_v13 }
  0x4d   :  { %915 = vmatpush1.bf16.msra.mxu0 %v914_v32  ;;  %v229_v21 = vld [vmem:[#allocation5 + $0x238] sm:$0xff]  ;;  %v231_v22 = vld [vmem:[#allocation5 + $0x248] sm:$0xff]  ;;  %v932_v24 = vpack.c.bf16 %v104_v17, %v102_v15  ;;  %v101_v25 = vld [vmem:[#allocation5 + $0x120] sm:$0xff]  ;;  %v962_v28 = vpack.c.bf16 %v226_v20, %v224_v19 }
  0x4e   :  { %917 = vmatprep.subr.bf16.mxu0 %v916_v36  ;;  %v103_v26 = vld [vmem:[#allocation5 + $0x130] sm:$0xff]  ;;  %v106_v27 = vld [vmem:[#allocation5 + $0x148] sm:$0xff]  ;;  %v108_v29 = vld [vmem:[#allocation5 + $0x158] sm:$0xff]  ;;  %v964_v30 = vpack.c.bf16 %v231_v22, %v229_v21 }
  0x4f   :  { %955 = vmatpush1.bf16.msra.mxu1 %v954_v4  ;;  %v228_v31 = vld [vmem:[#allocation5 + $0x230] sm:$0xff]  ;;  %v230_v32 = vld [vmem:[#allocation5 + $0x240] sm:$0xff]  ;;  %v233_v33 = vld [vmem:[#allocation5 + $0x258] sm:$0xff]  ;;  %v934_v35 = vpack.c.bf16 %v103_v26, %v101_v25  ;;  %v936_v36 = vpack.c.bf16 %v108_v29, %v106_v27 }
  0x50   :  { %957 = vmatprep.subr.bf16.mxu1 %v956_v6  ;;  %v235_v34 = vld [vmem:[#allocation5 + $0x268] sm:$0xff]  ;;  %v105_v37 = vld [vmem:[#allocation5 + $0x140] sm:$0xff]  ;;  %v107_v38 = vld [vmem:[#allocation5 + $0x150] sm:$0xff]  ;;  %v966_v40 = vpack.c.bf16 %v230_v32, %v228_v31 }
  0x51   :  { %919 = vmatpush1.bf16.msra.mxu0 %v918_v48  ;;  %v110_v39 = vld [vmem:[#allocation5 + $0x168] sm:$0xff]  ;;  %v112_v41 = vld [vmem:[#allocation5 + $0x178] sm:$0xff]  ;;  %v968_v42 = vpack.c.bf16 %v235_v34, %v233_v33  ;;  %v232_v43 = vld [vmem:[#allocation5 + $0x250] sm:$0xff]  ;;  %v938_v47 = vpack.c.bf16 %v107_v38, %v105_v37 }
  0x52   :  { %921 = vmatprep.subr.bf16.mxu0 %v920_v52  ;;  %v234_v44 = vld [vmem:[#allocation5 + $0x260] sm:$0xff]  ;;  %v237_v45 = vld [vmem:[#allocation5 + $0x278] sm:$0xff]  ;;  %v239_v46 = vld [vmem:[#allocation5 + $0x288] sm:$0xff]  ;;  %v940_v48 = vpack.c.bf16 %v112_v41, %v110_v39 }
  0x53   :  { %959 = vmatpush1.bf16.msra.mxu1 %v958_v16  ;;  %v109_v49 = vld [vmem:[#allocation5 + $0x160] sm:$0xff]  ;;  %v111_v50 = vld [vmem:[#allocation5 + $0x170] sm:$0xff]  ;;  %v970_v51 = vpack.c.bf16 %v234_v44, %v232_v43  ;;  %v972_v52 = vpack.c.bf16 %v239_v46, %v237_v45  ;;  %v241_v55 = vld [vmem:[#allocation5 + $0x298] sm:$0xff] }
  0x54   :  { %961 = vmatprep.subr.bf16.mxu1 %v960_v18  ;;  %v236_v53 = vld [vmem:[#allocation5 + $0x270] sm:$0xff]  ;;  %v238_v54 = vld [vmem:[#allocation5 + $0x280] sm:$0xff]  ;;  %v243_v56 = vld [vmem:[#allocation5 + $0x2a8] sm:$0xff]  ;;  %v942_v57 = vpack.c.bf16 %v111_v50, %v109_v49 }
  0x55   :  { %923 = vmatpush1.bf16.msra.mxu0 %v922_v63  ;;  %v974_v58 = vpack.c.bf16 %v238_v54, %v236_v53  ;;  %v114_v59 = vld [vmem:[#allocation5 + $0x188] sm:$0xf]  ;;  %v976_v60 = vpack.c.bf16 %v243_v56, %v241_v55  ;;  %v240_v61 = vld [vmem:[#allocation5 + $0x290] sm:$0xff]  ;;  %v242_v62 = vld [vmem:[#allocation5 + $0x2a0] sm:$0xff] }
  0x56   :  { %925 = vmatprep.subr.bf16.mxu0 %v924_v0  ;;  %v245_v63 = vld [vmem:[#allocation5 + $0x2b8] sm:$0xff]  ;;  %v247_v0 = vld [vmem:[#allocation5 + $0x2c8] sm:$0xff]  ;;  %v113_v1 = vld [vmem:[#allocation5 + $0x180] sm:$0xf]  ;;  %v978_v2 = vpack.c.bf16 %v242_v62, %v240_v61 }
  0x57   :  { %963 = vmatpush1.bf16.msra.mxu1 %v962_v28  ;;  %v63_v3 = vld [vmem:[#allocation2] sm:$0xff]  ;;  %v980_v4 = vpack.c.bf16 %v247_v0, %v245_v63  ;;  %v246_v6 = vld [vmem:[#allocation5 + $0x2c0] sm:$0xff]  ;;  %v249_v7 = vld [vmem:[#allocation5 + $0x2d8] sm:$0xff] }
  0x58   :  { %965 = vmatprep.subr.bf16.mxu1 %v964_v30  ;;  %v244_v5 = vld [vmem:[#allocation5 + $0x2b0] sm:$0xff]  ;;  %v251_v8 = vld [vmem:[#allocation5 + $0x2e8] sm:$0xff]  ;;  %v253_v14 = vld [vmem:[#allocation5 + $0x2f8] sm:$0xff] }
  0x59   :  { %927 = vmatpush1.bf16.msra.mxu0 %v926_v11  ;;  %v982_v9 = vpack.c.bf16 %v246_v6, %v244_v5  ;;  %v984_v10 = vpack.c.bf16 %v251_v8, %v249_v7  ;;  %v248_v11 = vld [vmem:[#allocation5 + $0x2d0] sm:$0xff]  ;;  %v255_v15 = vld [vmem:[#allocation5 + $0x308] sm:$0xff]  ;;  %v254_v18 = vld [vmem:[#allocation5 + $0x300] sm:$0xff] }
  0x5a   :  { %929 = vmatprep.subr.bf16.mxu0 %v928_v12  ;;  %v250_v12 = vld [vmem:[#allocation5 + $0x2e0] sm:$0xff]  ;;  %v988_v16 = vpack.c.bf16 %v255_v15, %v253_v14  ;;  %v252_v17 = vld [vmem:[#allocation5 + $0x2f0] sm:$0xff]  ;;  %v257_v20 = vld [vmem:[#allocation5 + $0x318] sm:$0xf] }
  0x5b   :  { %967 = vmatpush1.bf16.msra.mxu1 %v966_v40  ;;  %v986_v13 = vpack.c.bf16 %v250_v12, %v248_v11  ;;  %v990_v19 = vpack.c.bf16 %v254_v18, %v252_v17  ;;  %v256_v21 = vld [vmem:[#allocation5 + $0x310] sm:$0xf]  ;;  %v350_v22 = vld [vmem:[#allocation5 + $0x328] sm:$0xff]  ;;  %v356_v28 = vld [vmem:[#allocation5 + $0x358] sm:$0xff] }
  0x5c   :  { %969 = vmatprep.subr.bf16.mxu1 %v968_v42  ;;  %v351_v26 = vld [vmem:[#allocation5 + $0x330] sm:$0xff]  ;;  %v354_v27 = vld [vmem:[#allocation5 + $0x348] sm:$0xff]  ;;  %v353_v31 = vld [vmem:[#allocation5 + $0x340] sm:$0xff] }
  0x5d   :  { %931 = vmatpush1.bf16.msra.mxu0 %v930_v23  ;;  %v352_v23 = vld [vmem:[#allocation5 + $0x338] sm:$0xff]  ;;  %v996_v30 = vpack.c.bf16 %v356_v28, %v354_v27  ;;  %v355_v32 = vld [vmem:[#allocation5 + $0x350] sm:$0xff]  ;;  %v358_v33 = vld [vmem:[#allocation5 + $0x368] sm:$0xff] }
  0x5e   :  { %933 = vmatprep.subr.bf16.mxu0 %v932_v24  ;;  %v349_v24 = vld [vmem:[#allocation5 + $0x320] sm:$0xff]  ;;  %v992_v25 = vpack.c.bf16 %v352_v23, %v350_v22  ;;  %v360_v34 = vld [vmem:[#allocation5 + $0x378] sm:$0xff]  ;;  %v359_v38 = vld [vmem:[#allocation5 + $0x370] sm:$0xff] }
  0x5f   :  { %971 = vmatpush1.bf16.msra.mxu1 %v970_v51  ;;  %v994_v29 = vpack.c.bf16 %v351_v26, %v349_v24  ;;  %v357_v37 = vld [vmem:[#allocation5 + $0x360] sm:$0xff]  ;;  %v362_v39 = vld [vmem:[#allocation5 + $0x388] sm:$0xff]  ;;  %v364_v40 = vld [vmem:[#allocation5 + $0x398] sm:$0xff]  ;;  %v115_v24 = vlaneseq }
  0x60   :  { %973 = vmatprep.subr.bf16.mxu1 %v972_v52  ;;  %v1002_v41 = vpack.c.bf16 %v359_v38, %v357_v37  ;;  %v1004_v42 = vpack.c.bf16 %v364_v40, %v362_v39  ;;  %v361_v43 = vld [vmem:[#allocation5 + $0x380] sm:$0xff]  ;;  %v363_v44 = vld [vmem:[#allocation5 + $0x390] sm:$0xff]  ;;  %v366_v45 = vld [vmem:[#allocation5 + $0x3a8] sm:$0xff] }
  0x61   :  { %935 = vmatpush1.bf16.msra.mxu0 %v934_v35  ;;  %v998_v35 = vpack.c.bf16 %v355_v32, %v353_v31  ;;  %v368_v46 = vld [vmem:[#allocation5 + $0x3b8] sm:$0xff]  ;;  %v365_v49 = vld [vmem:[#allocation5 + $0x3a0] sm:$0xff]  ;;  %v367_v50 = vld [vmem:[#allocation5 + $0x3b0] sm:$0xff] }
  0x62   :  { %937 = vmatprep.subr.bf16.mxu0 %v936_v36  ;;  %v1000_v36 = vpack.c.bf16 %v360_v34, %v358_v33  ;;  %v370_v51 = vld [vmem:[#allocation5 + $0x3c8] sm:$0xff]  ;;  %v372_v52 = vld [vmem:[#allocation5 + $0x3d8] sm:$0xff]  ;;  %v1010_v53 = vpack.c.bf16 %v367_v50, %v365_v49  ;;  %v369_v55 = vld [vmem:[#allocation5 + $0x3c0] sm:$0xff] }
  0x63   :  { %975 = vmatpush1.bf16.msra.mxu1 %v974_v58  ;;  %v1012_v54 = vpack.c.bf16 %v372_v52, %v370_v51  ;;  %v371_v56 = vld [vmem:[#allocation5 + $0x3d0] sm:$0xff]  ;;  %v376_v58 = vld [vmem:[#allocation5 + $0x3f8] sm:$0xff]  ;;  %v373_v61 = vld [vmem:[#allocation5 + $0x3e0] sm:$0xff] }
  0x64   :  { %977 = vmatprep.subr.bf16.mxu1 %v976_v60  ;;  %v375_v62 = vld [vmem:[#allocation5 + $0x3f0] sm:$0xff]  ;;  %v378_v63 = vld [vmem:[#allocation5 + $0x408] sm:$0xff]  ;;  %v380_v0 = vld [vmem:[#allocation5 + $0x418] sm:$0xff] }
  0x65   :  { %939 = vmatpush1.bf16.msra.mxu0 %v938_v47  ;;  %v1006_v47 = vpack.c.bf16 %v363_v44, %v361_v43  ;;  %v382_v5 = vld [vmem:[#allocation5 + $0x428] sm:$0xff]  ;;  %v384_v6 = vld [vmem:[#allocation5 + $0x438] sm:$0xff]  ;;  %v385_v15 = vld [vmem:[#allocation5 + $0x440] sm:$0xff] }
  0x66   :  { %941 = vmatprep.subr.bf16.mxu0 %v940_v48  ;;  %v1008_v48 = vpack.c.bf16 %v368_v46, %v366_v45  ;;  %v1024_v8 = vpack.c.bf16 %v384_v6, %v382_v5  ;;  %v386_v11 = vld [vmem:[#allocation5 + $0x448] sm:$0xff]  ;;  %v388_v12 = vld [vmem:[#allocation5 + $0x458] sm:$0xff]  ;;  %v391_v22 = vld [vmem:[#allocation5 + $0x470] sm:$0xff] }
  0x67   :  { %979 = vmatpush1.bf16.msra.mxu1 %v978_v2  ;;  %v1020_v2 = vpack.c.bf16 %v380_v0, %v378_v63  ;;  %v1028_v14 = vpack.c.bf16 %v388_v12, %v386_v11  ;;  %v390_v17 = vld [vmem:[#allocation5 + $0x468] sm:$0xff]  ;;  %v392_v18 = vld [vmem:[#allocation5 + $0x478] sm:$0xff]  ;;  %v1463_v27 = vld [vmem:[#allocation7] sm:$0x1f] }
  0x68   :  { %981 = vmatprep.subr.bf16.mxu1 %v980_v4  ;;  %v379_v4 = vld [vmem:[#allocation5 + $0x410] sm:$0xff]  ;;  %v1465_v28 = vld [vmem:[#allocation7 + $0x8] sm:$0x1f]  ;;  %v394_v37 = vld [vmem:[#allocation5 + $0x488] sm:$0xff] }
  0x69   :  { %943 = vmatpush1.bf16.msra.mxu0 %v942_v57  ;;  %v374_v57 = vld [vmem:[#allocation5 + $0x3e8] sm:$0xff]  ;;  %v396_v38 = vld [vmem:[#allocation5 + $0x498] sm:$0xff]  ;;  %v393_v40 = vld [vmem:[#allocation5 + $0x480] sm:$0xff] }
  0x6a   :  { %881 = vmatprep.subr.msk.mxu0 %vm127_vm1, %v114_v59  ;;  %v1014_v59 = vpack.c.bf16 %v371_v56, %v369_v55  ;;  %v1016_v60 = vpack.c.bf16 %v376_v58, %v374_v57  ;;  %v1036_v39 = vpack.c.bf16 %v396_v38, %v394_v37  ;;  %v398_v43 = vld [vmem:[#allocation5 + $0x4a8] sm:$0xf]  ;;  %v397_v44 = vld [vmem:[#allocation5 + $0x4a0] sm:$0xf]  ;;  %v491_v45 = vld [vmem:[#allocation5 + $0x4b8] sm:$0xff] }
  0x6b   :  { %983 = vmatpush1.bf16.msra.mxu1 %v982_v9  ;;  %v381_v9 = vld [vmem:[#allocation5 + $0x420] sm:$0xff]  ;;  %v493_v46 = vld [vmem:[#allocation5 + $0x4c8] sm:$0xff]  ;;  %v495_v50 = vld [vmem:[#allocation5 + $0x4d8] sm:$0xff] }
  0x6c   :  { %985 = vmatprep.subr.bf16.mxu1 %v984_v10  ;;  %v383_v10 = vld [vmem:[#allocation5 + $0x430] sm:$0xff]  ;;  %v492_v49 = vld [vmem:[#allocation5 + $0x4c0] sm:$0xff]  ;;  %v497_v51 = vld [vmem:[#allocation5 + $0x4e8] sm:$0xff] }
  0x6d   :  { %882 = vmatpush1.msk.msra.mxu0 %vm127_vm1, %v113_v1  ;;  %v1018_v1 = vpack.c.bf16 %v375_v62, %v373_v61  ;;  %v496_v55 = vld [vmem:[#allocation5 + $0x4e0] sm:$0xff]  ;;  %v499_v56 = vld [vmem:[#allocation5 + $0x4f8] sm:$0xff]  ;;  %v501_v57 = vld [vmem:[#allocation5 + $0x508] sm:$0xff] }
  0x6e   :  { %199 = vmatmul.mubr.f32.vlgmr.msra.gmra.mrb[0].mxu0 %v63_v3  ;;  %993 = vmatprep.subr.bf16.mxu0 %v992_v25  ;;  %v377_v3 = vld [vmem:[#allocation5 + $0x400] sm:$0xff]  ;;  %v1460_v25 = vshrl.u32 %v115_v24, 7  ;;  %v503_v62 = vld [vmem:[#allocation5 + $0x518] sm:$0xff]  ;;  %v505_v63 = vld [vmem:[#allocation5 + $0x528] sm:$0xff] }
  0x6f   :  { %987 = vmatpush1.bf16.msra.mxu1 %v986_v13  ;;  %995 = vmatpush1.bf16.msra.mxu0 %v994_v29  ;;  %v1022_v7 = vpack.c.bf16 %v379_v4, %v377_v3  ;;  %v1026_v13 = vpack.c.bf16 %v383_v10, %v381_v9  ;;  %v500_v61 = vld [vmem:[#allocation5 + $0x500] sm:$0xff]  ;;  %v507_v4 = vld [vmem:[#allocation5 + $0x538] sm:$0xff]  ;;  %v509_v5 = vld [vmem:[#allocation5 + $0x548] sm:$0xff] }
  0x70   :  { %989 = vmatprep.subr.bf16.mxu1 %v988_v16  ;;  %997 = vmatprep.subr.bf16.mxu0 %v996_v30  ;;  %v387_v16 = vld [vmem:[#allocation5 + $0x450] sm:$0xff]  ;;  %v117_v26 = vsub.s32 0, %v1460_v25  ;;  %v504_v3 = vld [vmem:[#allocation5 + $0x520] sm:$0xff]  ;;  %v511_v10 = vld [vmem:[#allocation5 + $0x558] sm:$0xff] }
  0x71   :  { %v508_v9 = vld [vmem:[#allocation5 + $0x540] sm:$0xff]  ;;  %v513_v11 = vld [vmem:[#allocation5 + $0x568] sm:$0xff]  ;;  %v527_v37 = vld [vmem:[#allocation5 + $0x5d8] sm:$0xff] }
  0x72   :  { %v118_v29 = vrot.slane %v1463_v27, %v117_v26  ;;  %v122_v30 = vrot.slane %v1465_v28, %v117_v26  ;;  %v529_v38 = vld [vmem:[#allocation5 + $0x5e8] sm:$0xff] }
  0x73   :  { %991 = vmatpush1.bf16.msra.mxu1 %v990_v19  ;;  %999 = vmatpush1.bf16.msra.mxu0 %v998_v35  ;;  %v1030_v19 = vpack.c.bf16 %v387_v16, %v385_v15  ;;  %v512_v15 = vld [vmem:[#allocation5 + $0x560] sm:$0xff]  ;;  %v515_v16 = vld [vmem:[#allocation5 + $0x578] sm:$0xff] }
  0x74   :  { %884 = vmatprep.subr.msk.mxu1 %vm127_vm1, %v257_v20  ;;  %1001 = vmatprep.subr.bf16.mxu0 %v1000_v36  ;;  %v1032_v20 = vpack.c.bf16 %v392_v18, %v390_v17  ;;  %v517_v17 = vld [vmem:[#allocation5 + $0x588] sm:$0xff] }
  0x77   :  { %885 = vmatpush1.msk.msra.mxu1 %vm127_vm1, %v256_v21  ;;  %1003 = vmatpush1.bf16.msra.mxu0 %v1002_v41  ;;  %v389_v21 = vld [vmem:[#allocation5 + $0x460] sm:$0xff]  ;;  %v395_v41 = vld [vmem:[#allocation5 + $0x490] sm:$0xff] }
  0x78   :  { %1005 = vmatprep.subr.bf16.mxu0 %v1004_v42  ;;  %v1034_v23 = vpack.c.bf16 %v391_v22, %v389_v21  ;;  %v1038_v42 = vpack.c.bf16 %v395_v41, %v393_v40  ;;  %v516_v21 = vld [vmem:[#allocation5 + $0x580] sm:$0xff]  ;;  %v519_v22 = vld [vmem:[#allocation5 + $0x598] sm:$0xff]  ;;  %v1076_v40 = vpack.c.bf16 %v529_v38, %v527_v37  ;;  %v526_v41 = vld [vmem:[#allocation5 + $0x5d0] sm:$0xff] }
  0x7b   :  { %1007 = vmatpush1.bf16.msra.mxu0 %v1006_v47  ;;  %v490_v47 = vld [vmem:[#allocation5 + $0x4b0] sm:$0xff] }
  0x7c   :  { %1009 = vmatprep.subr.bf16.mxu0 %v1008_v48  ;;  %v1040_v48 = vpack.c.bf16 %v493_v46, %v491_v45  ;;  %v1042_v52 = vpack.c.bf16 %v492_v49, %v490_v47  ;;  %v530_v47 = vld [vmem:[#allocation5 + $0x5f0] sm:$0xff] }
  0x7e   :  { %1041 = vmatprep.subr.bf16.mxu1 %v1040_v48  ;;  %v532_v48 = vld [vmem:[#allocation5 + $0x600] sm:$0xff] }
  0x7f   :  { %1011 = vmatpush1.bf16.msra.mxu0 %v1010_v53  ;;  %v1044_v53 = vpack.c.bf16 %v497_v51, %v495_v50  ;;  %v1082_v49 = vpack.c.bf16 %v532_v48, %v530_v47  ;;  %v260_v50 = vsub.s32 1, %v1460_v25  ;;  %v660_v47 = vld [vmem:[#allocation5 + $0x728] sm:$0xff]  ;;  %v662_v48 = vld [vmem:[#allocation5 + $0x738] sm:$0xff] }
  0x80   :  { %1013 = vmatprep.subr.bf16.mxu0 %v1012_v54  ;;  %v494_v54 = vld [vmem:[#allocation5 + $0x4d0] sm:$0xff] }
  0x81   :  { %v1046_v58 = vpack.c.bf16 %v496_v55, %v494_v54  ;;  %v261_v51 = vrot.slane %v1463_v27, %v260_v50 }
  0x83   :  { %1015 = vmatpush1.bf16.msra.mxu0 %v1014_v59  ;;  %v1048_v59 = vpack.c.bf16 %v501_v57, %v499_v56 }
  0x84   :  { %1017 = vmatprep.subr.bf16.mxu0 %v1016_v60  ;;  %v498_v60 = vld [vmem:[#allocation5 + $0x4f0] sm:$0xff] }
  0x85   :  { %v1050_v0 = vpack.c.bf16 %v500_v61, %v498_v60  ;;  %v537_v60 = vld [vmem:[#allocation5 + $0x628] sm:$0xff] }
  0x87   :  { %1019 = vmatpush1.bf16.msra.mxu0 %v1018_v1  ;;  %v1052_v1 = vpack.c.bf16 %v505_v63, %v503_v62  ;;  %v534_v62 = vld [vmem:[#allocation5 + $0x610] sm:$0xff]  ;;  %v536_v63 = vld [vmem:[#allocation5 + $0x620] sm:$0xff] }
  0x88   :  { %1021 = vmatprep.subr.bf16.mxu0 %v1020_v2  ;;  %v502_v2 = vld [vmem:[#allocation5 + $0x510] sm:$0xff] }
  0x89   :  { %v1054_v6 = vpack.c.bf16 %v504_v3, %v502_v2  ;;  %v538_v2 = vld [vmem:[#allocation5 + $0x630] sm:$0xf]  ;;  %v632_v3 = vld [vmem:[#allocation5 + $0x648] sm:$0xff] }
  0x8b   :  { %1023 = vmatpush1.bf16.msra.mxu0 %v1022_v7  ;;  %v1056_v7 = vpack.c.bf16 %v509_v5, %v507_v4  ;;  %v634_v4 = vld [vmem:[#allocation5 + $0x658] sm:$0xff]  ;;  %v631_v5 = vld [vmem:[#allocation5 + $0x640] sm:$0xff] }
  0x8c   :  { %1025 = vmatprep.subr.bf16.mxu0 %v1024_v8  ;;  %v506_v8 = vld [vmem:[#allocation5 + $0x530] sm:$0xff] }
  0x8d   :  { %v1058_v12 = vpack.c.bf16 %v508_v9, %v506_v8  ;;  %v636_v8 = vld [vmem:[#allocation5 + $0x668] sm:$0xff]  ;;  %v638_v9 = vld [vmem:[#allocation5 + $0x678] sm:$0xff] }
  0x8f   :  { %1027 = vmatpush1.bf16.msra.mxu0 %v1026_v13  ;;  %v1060_v13 = vpack.c.bf16 %v513_v11, %v511_v10  ;;  %v1092_v11 = vpack.c.bf16 %v638_v9, %v636_v8  ;;  %v401_v8 = vsub.s32 2, %v1460_v25 }
  0x90   :  { %1029 = vmatprep.subr.bf16.mxu0 %v1028_v14  ;;  %v510_v14 = vld [vmem:[#allocation5 + $0x550] sm:$0xff] }
  0x91   :  { %v1062_v18 = vpack.c.bf16 %v512_v15, %v510_v14  ;;  %v640_v14 = vld [vmem:[#allocation5 + $0x688] sm:$0xff]  ;;  %v642_v15 = vld [vmem:[#allocation5 + $0x698] sm:$0xff]  ;;  %v402_v9 = vrot.slane %v1463_v27, %v401_v8 }
  0x93   :  { %1031 = vmatpush1.bf16.msra.mxu0 %v1030_v19  ;;  %v1064_v19 = vpack.c.bf16 %v517_v17, %v515_v16  ;;  %v1096_v17 = vpack.c.bf16 %v642_v15, %v640_v14 }
  0x94   :  { %1033 = vmatprep.subr.bf16.mxu0 %v1032_v20  ;;  %v514_v20 = vld [vmem:[#allocation5 + $0x570] sm:$0xff] }
  0x95   :  { %v1066_v24 = vpack.c.bf16 %v516_v21, %v514_v20  ;;  %v644_v20 = vld [vmem:[#allocation5 + $0x6a8] sm:$0xff]  ;;  %v646_v21 = vld [vmem:[#allocation5 + $0x6b8] sm:$0xff] }
  0x97   :  { %1035 = vmatpush1.bf16.msra.mxu0 %v1034_v23  ;;  %v521_v23 = vld [vmem:[#allocation5 + $0x5a8] sm:$0xff] }
  0x98   :  { %1037 = vmatprep.subr.bf16.mxu0 %v1036_v39  ;;  %v1068_v26 = vpack.c.bf16 %v521_v23, %v519_v22  ;;  %v1100_v23 = vpack.c.bf16 %v646_v21, %v644_v20  ;;  %v675_v20 = vld [vmem:[#allocation5 + $0x7a0] sm:$0xff]  ;;  %v677_v21 = vld [vmem:[#allocation5 + $0x7b0] sm:$0xff] }
  0x9b   :  { %1039 = vmatpush1.bf16.msra.mxu0 %v1038_v42  ;;  %v528_v42 = vld [vmem:[#allocation5 + $0x5e0] sm:$0xff] }
  0x9c   :  { %887 = vmatprep.subr.msk.mxu0 %vm127_vm1, %v398_v43  ;;  %v531_v43 = vld [vmem:[#allocation5 + $0x5f8] sm:$0xff]  ;;  %v1078_v45 = vpack.c.bf16 %v528_v42, %v526_v41  ;;  %v656_v41 = vld [vmem:[#allocation5 + $0x708] sm:$0xff] }
  0x9d   :  { %v658_v42 = vld [vmem:[#allocation5 + $0x718] sm:$0xff] }
  0x9f   :  { %888 = vmatpush1.msk.msra.mxu0 %vm127_vm1, %v397_v44  ;;  %v533_v44 = vld [vmem:[#allocation5 + $0x608] sm:$0xff] }
  0xa0   :  { %v1080_v46 = vpack.c.bf16 %v533_v44, %v531_v43  ;;  %v1112_v44 = vpack.c.bf16 %v658_v42, %v656_v41 }
 0x141   :  { %v200_v31 = vpop.f32.mrb[0].mxu0 }
 0x142   :  { %v201_v32 = vadd.f32 %v200_v31, %v118_v29  ;;  %v202_v33 = vpop.f32.mrb[1].mxu0  ;;  %v518_v29 = vld [vmem:[#allocation5 + $0x590] sm:$0xff]  ;;  %v523_v31 = vld [vmem:[#allocation5 + $0x5b8] sm:$0xff] }
 0x143   :  { %v203_v34 = vadd.f32 %v202_v33, %v122_v30  ;;  %v520_v30 = vld [vmem:[#allocation5 + $0x5a0] sm:$0xff] }
 0x144   :  { %v205_v35 = vmax.f32 %v201_v32, 0.0  ;;  %v525_v32 = vld [vmem:[#allocation5 + $0x5c8] sm:$0xff]  ;;  %v1070_v33 = vpack.c.bf16 %v520_v30, %v518_v29  ;;  %v650_v30 = vld [vmem:[#allocation5 + $0x6d8] sm:$0xff] }
 0x145   :  { %v206_v36 = vmax.f32 %v203_v34, 0.0  ;;  %v1072_v34 = vpack.c.bf16 %v525_v32, %v523_v31  ;;  %v648_v29 = vld [vmem:[#allocation5 + $0x6c8] sm:$0xff] }
 0x146   :  { %769 = vst [vmem:[#allocation8] sm:$0xff] %v205_v35  ;;  %v1104_v32 = vpack.c.bf16 %v650_v30, %v648_v29 }
 0x147   :  { %770 = vst.msk [vmem:[#allocation8 + $0x8] sm:$0xff] %vm123_vm0, %v206_v36  ;;  %886 = vmatprep.mubr.msk.f32.mxu1 %vm123_vm0, %v206_v36  ;;  %v524_v36 = vld [vmem:[#allocation5 + $0x5c0] sm:$0xff] }
 0x148   :  { %340 = vmatmul.mubr.f32.vlgmr.msra.gmra.mrb[0].mxu1 %v205_v35  ;;  %v522_v35 = vld [vmem:[#allocation5 + $0x5b0] sm:$0xff] }
 0x149   :  { %1043 = vmatpush1.bf16.msra.mxu1 %v1042_v52  ;;  %v1074_v39 = vpack.c.bf16 %v524_v36, %v522_v35  ;;  %v265_v52 = vrot.slane %v1465_v28, %v260_v50  ;;  %v652_v35 = vld [vmem:[#allocation5 + $0x6e8] sm:$0xff]  ;;  %v654_v36 = vld [vmem:[#allocation5 + $0x6f8] sm:$0xff]  ;;  %v1116_v50 = vpack.c.bf16 %v662_v48, %v660_v47 }
 0x14a   :  { %1045 = vmatprep.subr.bf16.mxu1 %v1044_v53  ;;  %v1108_v38 = vpack.c.bf16 %v654_v36, %v652_v35 }
 0x14d   :  { %1047 = vmatpush1.bf16.msra.mxu1 %v1046_v58 }
 0x14e   :  { %1049 = vmatprep.subr.bf16.mxu1 %v1048_v59  ;;  %v535_v59 = vld [vmem:[#allocation5 + $0x618] sm:$0xff] }
 0x14f   :  { %v1084_v61 = vpack.c.bf16 %v537_v60, %v535_v59  ;;  %v668_v59 = vld [vmem:[#allocation5 + $0x768] sm:$0xff]  ;;  %v670_v60 = vld [vmem:[#allocation5 + $0x778] sm:$0xff] }
 0x151   :  { %1051 = vmatpush1.bf16.msra.mxu1 %v1050_v0  ;;  %v1086_v0 = vpack.c.bf16 %v536_v63, %v534_v62  ;;  %v1124_v62 = vpack.c.bf16 %v670_v60, %v668_v59  ;;  %v667_v63 = vld [vmem:[#allocation5 + $0x760] sm:$0xff] }
 0x152   :  { %1053 = vmatprep.subr.bf16.mxu1 %v1052_v1  ;;  %v539_v1 = vld [vmem:[#allocation5 + $0x638] sm:$0xf] }
 0x155   :  { %1055 = vmatpush1.bf16.msra.mxu1 %v1054_v6  ;;  %v1088_v6 = vpack.c.bf16 %v634_v4, %v632_v3 }
 0x156   :  { %1057 = vmatprep.subr.bf16.mxu1 %v1056_v7  ;;  %v633_v7 = vld [vmem:[#allocation5 + $0x650] sm:$0xff] }
 0x157   :  { %v1090_v10 = vpack.c.bf16 %v633_v7, %v631_v5  ;;  %1089 = vmatprep.subr.bf16.mxu0 %v1088_v6  ;;  %v671_v5 = vld [vmem:[#allocation5 + $0x780] sm:$0xff]  ;;  %v673_v6 = vld [vmem:[#allocation5 + $0x790] sm:$0xff] }
 0x158   :  { %v1130_v7 = vpack.c.bf16 %v673_v6, %v671_v5 }
 0x159   :  { %1059 = vmatpush1.bf16.msra.mxu1 %v1058_v12  ;;  %v635_v12 = vld [vmem:[#allocation5 + $0x660] sm:$0xff] }
 0x15a   :  { %1061 = vmatprep.subr.bf16.mxu1 %v1060_v13  ;;  %v637_v13 = vld [vmem:[#allocation5 + $0x670] sm:$0xff] }
 0x15b   :  { %v1094_v16 = vpack.c.bf16 %v637_v13, %v635_v12 }
 0x15d   :  { %1063 = vmatpush1.bf16.msra.mxu1 %v1062_v18  ;;  %v639_v18 = vld [vmem:[#allocation5 + $0x680] sm:$0xff] }
 0x15e   :  { %1065 = vmatprep.subr.bf16.mxu1 %v1064_v19  ;;  %v641_v19 = vld [vmem:[#allocation5 + $0x690] sm:$0xff] }
 0x15f   :  { %v1098_v22 = vpack.c.bf16 %v641_v19, %v639_v18  ;;  %v678_v18 = vld [vmem:[#allocation5 + $0x7b8] sm:$0xff] }
 0x161   :  { %1067 = vmatpush1.bf16.msra.mxu1 %v1066_v24  ;;  %v643_v24 = vld [vmem:[#allocation5 + $0x6a0] sm:$0xff] }
 0x162   :  { %1069 = vmatprep.subr.bf16.mxu1 %v1068_v26  ;;  %v645_v26 = vld [vmem:[#allocation5 + $0x6b0] sm:$0xff] }
 0x163   :  { %v1102_v31 = vpack.c.bf16 %v645_v26, %v643_v24  ;;  %v679_v24 = vld [vmem:[#allocation5 + $0x7c0] sm:$0xf]  ;;  %v542_v26 = vsub.s32 3, %v1460_v25 }
 0x165   :  { %1071 = vmatpush1.bf16.msra.mxu1 %v1070_v33  ;;  %v647_v33 = vld [vmem:[#allocation5 + $0x6c0] sm:$0xff]  ;;  %v543_v29 = vrot.slane %v1463_v27, %v542_v26  ;;  %v547_v30 = vrot.slane %v1465_v28, %v542_v26 }
 0x166   :  { %1073 = vmatprep.subr.bf16.mxu1 %v1072_v34  ;;  %v649_v34 = vld [vmem:[#allocation5 + $0x6d0] sm:$0xff] }
 0x167   :  { %v1106_v37 = vpack.c.bf16 %v649_v34, %v647_v33 }
 0x169   :  { %1075 = vmatpush1.bf16.msra.mxu1 %v1074_v39  ;;  %v651_v39 = vld [vmem:[#allocation5 + $0x6e0] sm:$0xff] }
 0x16a   :  { %1077 = vmatprep.subr.bf16.mxu1 %v1076_v40  ;;  %v653_v40 = vld [vmem:[#allocation5 + $0x6f0] sm:$0xff] }
 0x16b   :  { %v1110_v43 = vpack.c.bf16 %v653_v40, %v651_v39 }
 0x16d   :  { %1079 = vmatpush1.bf16.msra.mxu1 %v1078_v45  ;;  %v655_v45 = vld [vmem:[#allocation5 + $0x700] sm:$0xff] }
 0x16e   :  { %1081 = vmatprep.subr.bf16.mxu1 %v1080_v46  ;;  %v657_v46 = vld [vmem:[#allocation5 + $0x710] sm:$0xff] }
 0x171   :  { %1083 = vmatpush1.bf16.msra.mxu1 %v1082_v49  ;;  %v1114_v49 = vpack.c.bf16 %v657_v46, %v655_v45 }
 0x172   :  { %1085 = vmatprep.subr.bf16.mxu1 %v1084_v61 }
 0x175   :  { %1087 = vmatpush1.bf16.msra.mxu1 %v1086_v0  ;;  %v669_v0 = vld [vmem:[#allocation5 + $0x770] sm:$0xff] }
 0x176   :  { %890 = vmatprep.subr.msk.mxu1 %vm127_vm1, %v539_v1  ;;  %v672_v1 = vld [vmem:[#allocation5 + $0x788] sm:$0xff]  ;;  %v1126_v3 = vpack.c.bf16 %v669_v0, %v667_v63 }
 0x179   :  { %891 = vmatpush1.msk.msra.mxu1 %vm127_vm1, %v538_v2  ;;  %v674_v2 = vld [vmem:[#allocation5 + $0x798] sm:$0xff] }
 0x17a   :  { %v1128_v4 = vpack.c.bf16 %v674_v2, %v672_v1 }
 0x21b   :  { %v341_v53 = vpop.f32.mrb[0].mxu1 }
 0x21c   :  { %v342_v54 = vadd.f32 %v341_v53, %v261_v51  ;;  %v343_v55 = vpop.f32.mrb[1].mxu1  ;;  %v659_v51 = vld [vmem:[#allocation5 + $0x720] sm:$0xff]  ;;  %v664_v53 = vld [vmem:[#allocation5 + $0x748] sm:$0xff] }
 0x21d   :  { %v344_v56 = vadd.f32 %v343_v55, %v265_v52  ;;  %v661_v52 = vld [vmem:[#allocation5 + $0x730] sm:$0xff] }
 0x21e   :  { %v346_v57 = vmax.f32 %v342_v54, 0.0  ;;  %v666_v54 = vld [vmem:[#allocation5 + $0x758] sm:$0xff]  ;;  %v1118_v55 = vpack.c.bf16 %v661_v52, %v659_v51 }
 0x21f   :  { %v347_v58 = vmax.f32 %v344_v56, 0.0  ;;  %v1120_v56 = vpack.c.bf16 %v666_v54, %v664_v53 }
 0x220   :  { %771 = vst [vmem:[#allocation9] sm:$0xff] %v346_v57 }
 0x221   :  { %772 = vst.msk [vmem:[#allocation9 + $0x8] sm:$0xff] %vm123_vm0, %v347_v58  ;;  %889 = vmatprep.mubr.msk.f32.mxu0 %vm123_vm0, %v347_v58  ;;  %v665_v58 = vld [vmem:[#allocation5 + $0x750] sm:$0xff] }
 0x222   :  { %481 = vmatmul.mubr.f32.vlgmr.msra.gmra.mrb[2].mxu0 %v346_v57  ;;  %v663_v57 = vld [vmem:[#allocation5 + $0x740] sm:$0xff] }
 0x223   :  { %1091 = vmatpush1.bf16.msra.mxu0 %v1090_v10  ;;  %v1122_v61 = vpack.c.bf16 %v665_v58, %v663_v57  ;;  %v406_v10 = vrot.slane %v1465_v28, %v401_v8 }
 0x224   :  { %1093 = vmatprep.subr.bf16.mxu0 %v1092_v11 }
 0x227   :  { %1095 = vmatpush1.bf16.msra.mxu0 %v1094_v16 }
 0x228   :  { %1097 = vmatprep.subr.bf16.mxu0 %v1096_v17  ;;  %v676_v17 = vld [vmem:[#allocation5 + $0x7a8] sm:$0xff] }
 0x229   :  { %v1132_v19 = vpack.c.bf16 %v678_v18, %v676_v17 }
 0x22b   :  { %1099 = vmatpush1.bf16.msra.mxu0 %v1098_v22  ;;  %v1134_v22 = vpack.c.bf16 %v677_v21, %v675_v20 }
 0x22c   :  { %1101 = vmatprep.subr.bf16.mxu0 %v1100_v23  ;;  %v680_v23 = vld [vmem:[#allocation5 + $0x7c8] sm:$0xf] }
 0x22f   :  { %1103 = vmatpush1.bf16.msra.mxu0 %v1102_v31 }
 0x230   :  { %1105 = vmatprep.subr.bf16.mxu0 %v1104_v32 }
 0x233   :  { %1107 = vmatpush1.bf16.msra.mxu0 %v1106_v37  ;;  %v683_v37 = vsub.s32 4, %v1460_v25 }
 0x234   :  { %1109 = vmatprep.subr.bf16.mxu0 %v1108_v38 }
 0x235   :  { %v684_v38 = vrot.slane %v1463_v27, %v683_v37  ;;  %v688_v39 = vrot.slane %v1465_v28, %v683_v37 }
 0x237   :  { %1111 = vmatpush1.bf16.msra.mxu0 %v1110_v43 }
 0x238   :  { %1113 = vmatprep.subr.bf16.mxu0 %v1112_v44 }
 0x23b   :  { %1115 = vmatpush1.bf16.msra.mxu0 %v1114_v49 }
 0x23c   :  { %1117 = vmatprep.subr.bf16.mxu0 %v1116_v50 }
 0x23f   :  { %1119 = vmatpush1.bf16.msra.mxu0 %v1118_v55 }
 0x240   :  { %1121 = vmatprep.subr.bf16.mxu0 %v1120_v56 }
 0x243   :  { %1123 = vmatpush1.bf16.msra.mxu0 %v1122_v61 }
 0x244   :  { %1125 = vmatprep.subr.bf16.mxu0 %v1124_v62 }
 0x247   :  { %1127 = vmatpush1.bf16.msra.mxu0 %v1126_v3 }
 0x248   :  { %1129 = vmatprep.subr.bf16.mxu0 %v1128_v4 }
 0x24b   :  { %1131 = vmatpush1.bf16.msra.mxu0 %v1130_v7 }
 0x24c   :  { %1133 = vmatprep.subr.bf16.mxu0 %v1132_v19 }
 0x24f   :  { %1135 = vmatpush1.bf16.msra.mxu0 %v1134_v22 }
 0x250   :  { %893 = vmatprep.subr.msk.mxu0 %vm127_vm1, %v680_v23 }
 0x253   :  { %894 = vmatpush1.msk.msra.mxu0 %vm127_vm1, %v679_v24 }
 0x2f5   :  { %v482_v11 = vpop.f32.mrb[2].mxu0 }
 0x2f6   :  { %v483_v12 = vadd.f32 %v482_v11, %v402_v9  ;;  %v484_v13 = vpop.f32.mrb[3].mxu0 }
 0x2f7   :  { %v485_v14 = vadd.f32 %v484_v13, %v406_v10 }
 0x2f8   :  { %v487_v15 = vmax.f32 %v483_v12, 0.0 }
 0x2f9   :  { %v488_v16 = vmax.f32 %v485_v14, 0.0 }
 0x2fa   :  { %773 = vst [vmem:[#allocation11] sm:$0xff] %v487_v15 }
 0x2fb   :  { %774 = vst.msk [vmem:[#allocation11 + $0x8] sm:$0xff] %vm123_vm0, %v488_v16  ;;  %892 = vmatprep.mubr.msk.f32.mxu1 %vm123_vm0, %v488_v16 }
 0x2fc   :  { %622 = vmatmul.mubr.f32.vlgmr.msra.gmra.mrb[2].mxu1 %v487_v15 }
 0x3cf   :  { %v623_v31 = vpop.f32.mrb[2].mxu1 }
 0x3d0   :  { %v624_v32 = vadd.f32 %v623_v31, %v543_v29  ;;  %v625_v33 = vpop.f32.mrb[3].mxu1 }
 0x3d1   :  { %v626_v34 = vadd.f32 %v625_v33, %v547_v30 }
 0x3d2   :  { %v628_v35 = vmax.f32 %v624_v32, 0.0 }
 0x3d3   :  { %v629_v36 = vmax.f32 %v626_v34, 0.0 }
 0x3d4   :  { %775 = vst [vmem:[#allocation12] sm:$0xff] %v628_v35 }
 0x3d5   :  { %776 = vst.msk [vmem:[#allocation12 + $0x8] sm:$0xff] %vm123_vm0, %v629_v36  ;;  %895 = vmatprep.mubr.msk.f32.mxu0 %vm123_vm0, %v629_v36 }
 0x3d6   :  { %763 = vmatmul.mubr.f32.vlgmr.msra.gmra.mrb[4].mxu0 %v628_v35 }
 0x4a9   :  { %v764_v40 = vpop.f32.mrb[4].mxu0 }
 0x4aa   :  { %v765_v41 = vadd.f32 %v764_v40, %v684_v38  ;;  %v766_v42 = vpop.f32.mrb[5].mxu0 }
 0x4ab   :  { %v767_v43 = vadd.f32 %v766_v42, %v688_v39 }
 0x4ac   :  { %796 = vst.msk [vmem:[#allocation15] sm:$0xff] %vm794_vm2, %v765_v41 }
 0x4ad   :  { %v777_v44 = vsel %vm123_vm0, %v767_v43, -inf }
 0x4ae   :  { %v778_v45 = vmax.f32 %v765_v41, %v777_v44 }
 0x4b0   :  { %779 = vmax.xlane.f32.xlu0 %v778_v45 }
 0x53d   :  { %v780_v46 = vpop.xlane.xlu0 %779 }
 0x53e   :  { %v1497_v47 = vsub.f32 %v765_v41, %v780_v46  ;;  %v782_v48 = vsub.f32 %v767_v43, %v780_v46 }
 0x540   :  { %v783_v25 = vmul.f32 1.442695, %v1497_v47  ;;  %v785_v27 = vmul.f32 1.442695, %v782_v48 }
 0x542   :  { %1147 = vpow2.f32 %v783_v25 }
 0x543   :  { %1149 = vpow2.f32 %v785_v27 }
 0x54c   :  { %v1148_v28 = vpop.eup %1147 }
 0x54d   :  { %v1150_v49 = vpop.eup %1149 }
 0x54e   :  { %v787_v50 = vsel %vm123_vm0, %v1150_v49, 0.0 }
 0x54f   :  { %v788_v51 = vadd.f32 %v1148_v28, %v787_v50 }
 0x551   :  { %789 = vadd.xlane.f32.xlu0 %v788_v51 }
 0x552   :  { %1230 = shalt.err (!%p1227_p0)
}
 0x553   :  { %s1231_s25 = scalar_lea.hbm %s1579_s4, 256 }
 0x554   :  { %p1232_p1 = scmp.ne.s32.totalorder %s1579_s4, %s1231_s25  ;;  %p1235_p2 = scmp.lt.u32.totalorder %s1231_s25, %s1579_s4 }
 0x556   :  { %p1237_p3 = pnand %p1235_p2, %p1232_p1 }
 0x558   :  { %1240 = shalt.err (!%p1237_p3)
}
 0x559   :  { %816 = dma.vmem_to_hbm [thread:$0]  %s814_s19, 256, %s1579_s4, [#allocation10]  }
 0x55a   :  { %s1241_s9 = scalar_lea.vmem %s834_s21, 256  ;;  %p1246_p5 = scmp.lt.s32.totalorder %s834_s21, %s834_s21 }
 0x55b   :  { %p1242_p4 = scmp.ne.s32.totalorder %s834_s21, %s1241_s9  ;;  %p1247_p6 = scmp.lt.s32.totalorder %s1241_s9, %s1241_s9 }
 0x55d   :  { %p1248_p7 = por %p1247_p6, %p1246_p5 }
 0x55f   :  { %p1249_p8 = pnand %p1248_p7, %p1242_p4 }
 0x561   :  { %1252 = shalt.err (!%p1249_p8)
}
 0x562   :  { %s1253_s12 = scalar_lea.hbm %s1581_s6, 256 }
 0x563   :  { %p1254_p9 = scmp.ne.s32.totalorder %s1581_s6, %s1253_s12  ;;  %p1257_p10 = scmp.lt.u32.totalorder %s1253_s12, %s1581_s6 }
 0x565   :  { %p1259_p11 = pnand %p1257_p10, %p1254_p9 }
 0x567   :  { %1262 = shalt.err (!%p1259_p11)
}
 0x568   :  { %836 = dma.vmem_to_hbm [thread:$0]  %s834_s21, 256, %s1581_s6, [#allocation13]  }
 0x569   :  { %s1370_s0 = smov [#allocation8]   ;;  %s1371_s2 = smov [#allocation11]  }
 0x56a   :  { %s803_s18 = sshll.u32 %s1370_s0, 4  ;;  %s823_s19 = sshll.u32 %s1371_s2, 4  ;;  %s804_s18 = int_to_ptr.vmem [resolvable:$true] %s803_s18  ;;  %s824_s19 = int_to_ptr.vmem [resolvable:$true] %s823_s19 }
 0x56b   :  { %s1263_s20 = scalar_lea.vmem %s804_s18, 256  ;;  %p1268_p13 = scmp.lt.s32.totalorder %s804_s18, %s804_s18 }
 0x56c   :  { %p1264_p12 = scmp.ne.s32.totalorder %s804_s18, %s1263_s20  ;;  %p1269_p0 = scmp.lt.s32.totalorder %s1263_s20, %s1263_s20 }
 0x56e   :  { %p1270_p1 = por %p1269_p0, %p1268_p13 }
 0x570   :  { %p1271_p2 = pnand %p1270_p1, %p1264_p12 }
 0x572   :  { %1274 = shalt.err (!%p1271_p2)
}
 0x573   :  { %s1275_s24 = scalar_lea.hbm %s1578_s3, 256 }
 0x574   :  { %p1276_p3 = scmp.ne.s32.totalorder %s1578_s3, %s1275_s24  ;;  %p1279_p4 = scmp.lt.u32.totalorder %s1275_s24, %s1578_s3 }
 0x576   :  { %p1281_p5 = pnand %p1279_p4, %p1276_p3 }
 0x578   :  { %1284 = shalt.err (!%p1281_p5)
}
 0x579   :  { %806 = dma.vmem_to_hbm [thread:$0]  %s804_s18, 256, %s1578_s3, [#allocation4]  }
 0x57a   :  { %s1285_s30 = scalar_lea.vmem %s824_s19, 256  ;;  %p1290_p7 = scmp.lt.s32.totalorder %s824_s19, %s824_s19 }
 0x57b   :  { %p1286_p6 = scmp.ne.s32.totalorder %s824_s19, %s1285_s30  ;;  %p1291_p8 = scmp.lt.s32.totalorder %s1285_s30, %s1285_s30 }
 0x57d   :  { %p1292_p9 = por %p1291_p8, %p1290_p7 }
 0x57f   :  { %p1293_p10 = pnand %p1292_p9, %p1286_p6 }
 0x581   :  { %1296 = shalt.err (!%p1293_p10)
}
 0x582   :  { %s1297_s9 = scalar_lea.hbm %s1580_s5, 256 }
 0x583   :  { %p1298_p11 = scmp.ne.s32.totalorder %s1580_s5, %s1297_s9  ;;  %p1301_p12 = scmp.lt.u32.totalorder %s1297_s9, %s1580_s5 }
 0x585   :  { %p1303_p13 = pnand %p1301_p12, %p1298_p11 }
 0x587   :  { %1306 = shalt.err (!%p1303_p13)
}
 0x588   :  { %826 = dma.vmem_to_hbm [thread:$0]  %s824_s19, 256, %s1580_s5, [#allocation10]  }
 0x589   :  { %s1372_s15 = smov [#allocation15]  }
 0x58a   :  { %s853_s16 = sshll.u32 %s1372_s15, 4  ;;  %s854_s16 = int_to_ptr.vmem [resolvable:$true] %s853_s16 }
 0x58b   :  { %s1307_s4 = scalar_lea.vmem %s854_s16, 128  ;;  %p1312_p1 = scmp.lt.s32.totalorder %s854_s16, %s854_s16 }
 0x58c   :  { %p1308_p0 = scmp.ne.s32.totalorder %s854_s16, %s1307_s4  ;;  %p1313_p2 = scmp.lt.s32.totalorder %s1307_s4, %s1307_s4 }
 0x58e   :  { %p1314_p3 = por %p1313_p2, %p1312_p1 }
 0x590   :  { %p1315_p4 = pnand %p1314_p3, %p1308_p0 }
 0x592   :  { %1318 = shalt.err (!%p1315_p4)
}
 0x593   :  { %s1319_s18 = scalar_lea.hbm %s1583_s8, 128 }
 0x594   :  { %p1320_p5 = scmp.ne.s32.totalorder %s1583_s8, %s1319_s18  ;;  %p1323_p6 = scmp.lt.u32.totalorder %s1319_s18, %s1583_s8 }
 0x596   :  { %p1325_p7 = pnand %p1323_p6, %p1320_p5 }
 0x598   :  { %1328 = shalt.err (!%p1325_p7)
}
 0x599   :  { %856 = dma.vmem_to_hbm [thread:$0]  %s854_s16, 128, %s1583_s8, [#allocation16]  }
 0x59a   :  { %s1373_s24 = smov [#allocation14]  }
 0x59b   :  { %s843_s25 = sshll.u32 %s1373_s24, 4  ;;  %s844_s25 = int_to_ptr.vmem [resolvable:$true] %s843_s25 }
 0x59c   :  { %s1329_s26 = scalar_lea.vmem %s844_s25, 128  ;;  %p1334_p9 = scmp.lt.s32.totalorder %s844_s25, %s844_s25 }
 0x59d   :  { %p1330_p8 = scmp.ne.s32.totalorder %s844_s25, %s1329_s26  ;;  %p1335_p10 = scmp.lt.s32.totalorder %s1329_s26, %s1329_s26 }
 0x59f   :  { %p1336_p11 = por %p1335_p10, %p1334_p9 }
 0x5a1   :  { %p1337_p12 = pnand %p1336_p11, %p1330_p8 }
 0x5de   :  { %v790_v52 = vpop.xlane.xlu0 %789 }
 0x5df   :  { %1151 = vlog2.f32 %v790_v52 }
 0x5e9   :  { %v1152_v53 = vpop.eup %1151 }
 0x5ea   :  { %v792_v54 = vmul.f32 0.6931472, %v1152_v53 }
 0x5ec   :  { %v793_v55 = vsub.f32 %v1497_v47, %v792_v54 }
 0x5ee   :  { %795 = vst.msk [vmem:[#allocation14] sm:$0xff] %vm794_vm2, %v793_v55 }
 0x5ef   :  { %1340 = shalt.err (!%p1337_p12)
}
 0x5f0   :  { %s1341_s21 = scalar_lea.hbm %s1582_s7, 128 }
 0x5f1   :  { %p1342_p13 = scmp.ne.s32.totalorder %s1582_s7, %s1341_s21  ;;  %p1345_p0 = scmp.lt.u32.totalorder %s1341_s21, %s1582_s7 }
 0x5f3   :  { %p1347_p1 = pnand %p1345_p0, %p1342_p13 }
 0x5f5   :  { %1350 = shalt.err (!%p1347_p1)
}
 0x5f6   :  { %846 = dma.vmem_to_hbm [thread:$0]  %s844_s25, 128, %s1582_s7, [#allocation13]  }
 0x5f7   :  { %1355 = dma.done.wait [#allocation4], 256  }
 0x5f8   :  { %1356 = vsyncadd [#allocation4], 4294967040 }
 0x5f9   :  { %1357 = dma.done.wait [#allocation10], 512  }
 0x5fa   :  { %1358 = vsyncadd [#allocation10], 4294966784 }
 0x5fb   :  { %1359 = dma.done.wait [#allocation13], 384  }
 0x5fc   :  { %1360 = vsyncadd [#allocation13], 4294966912 }
 0x5fd   :  { %1361 = dma.done.wait [#allocation16], 128  }
 0x5fe   :  { %1362 = vsyncadd [#allocation16], 4294967168 }
 0x5ff   :  { %875 = vsyncpa [#allocation3], 1 }
 0x600   :  { %876 = vsyncpa [#allocation6], 1 }
 0x601   :  { %877 = vsyncpa [#allocation4], 1 }
 0x602   :  { %878 = vsyncpa [#allocation10], 1 }
 0x603   :  { %879 = vsyncpa [#allocation13], 1 }
 0x604   :  { %880 = vsyncpa [#allocation16], 1 }

</bundles_post_ra>
